<compile_context>
chip_gen: v7x
topology: tpu7x:2x2x1
jax: 0.10.0
libtpu: 0.0.40
codegen_flags: <defaults>
</compile_context>

<pallas_src>
import functools

import jax
import jax.numpy as jnp
from jax.experimental import pallas as pl
from jax.experimental.pallas import tpu as pltpu


# ----------------------------------------------------------------------------
# Fused kernel: 2-layer GRU + LayerNorm + SVGP predictive mean + un-normalize
# ----------------------------------------------------------------------------
def fused_gru_svgp_kernel(x_ref,                          # (T*B, Dp)  time-major rows, Din padded
                          wih0_ref, whh0_ref,             # (Dp,3H), (H,3H)  fused r|z|n, pre-transposed
                          b0i_ref, b0h_ref,               # (1,3H) [bir+bhr|biz+bhz|bin], (1,3H) [0|0|bhn]
                          wih1_ref, whh1_ref,             # (H,3H), (H,3H)
                          b1i_ref, b1h_ref,               # (1,3H), (1,3H)
                          gamma_ref, beta_ref,            # LayerNorm (1,H)
                          zu_t_ref, u2_ref, alpha_ref,    # (H,M), (1,M), (1,M)
                          scal_ref,                       # SMEM (6,)
                          out_ref,                        # (B,1)
                          *, T, B):
    H = whh0_ref.shape[0]
    f32 = jnp.float32

    def mm(a, b):
        return jnp.dot(a, b, preferred_element_type=f32)

    # Fused recurrent weights/biases loaded once: after gate fusion each (H,3H) matrix is only
    # ~3 vregs, so the whole-kernel footprint stays well inside the 64-vreg file (no spills).
    whh0 = whh0_ref[...]
    whh1 = whh1_ref[...]
    wih1 = wih1_ref[...]
    b0h = b0h_ref[...]
    b1i = b1i_ref[...]
    b1h = b1h_ref[...]

    # ---- layer-0 input projections for ALL timesteps: one batched matmul ------------------
    gi0 = mm(x_ref[...], wih0_ref[...]) + b0i_ref[...]            # (T*B, 3H)

    def gru_cell(gi, h, whh, bh):
        # gi: (B,3H) precomputed input projection (+ fused input-side biases)
        # gh: (B,3H) recurrent projection; bh carries b_hn in its last H lanes (zeros elsewhere)
        gh = mm(h, whh) + bh
        ru = jax.nn.sigmoid(gi[:, :2 * H] + gh[:, :2 * H])         # r|z in one EUP pass
        r = ru[:, :H]
        u = ru[:, H:]
        n = jnp.tanh(gi[:, 2 * H:] + r * gh[:, 2 * H:])
        return (1.0 - u) * n + u * h

    # ---- interleaved 2-layer recurrence, fully unrolled (T small & static) ----------------
    h0 = jnp.zeros((B, H), f32)
    h1 = jnp.zeros((B, H), f32)
    for t in range(T):
        h0 = gru_cell(gi0[t * B:(t + 1) * B, :], h0, whh0, b0h)
        gi1 = mm(h0, wih1) + b1i          # depends only on h0_t -> off the h1 serial chain
        h1 = gru_cell(gi1, h1, whh1, b1h)

    # ---- LayerNorm over the feature dim (torch default eps = 1e-5) ------------------------
    mean = jnp.mean(h1, axis=-1, keepdims=True)
    var = jnp.mean((h1 - mean) ** 2, axis=-1, keepdims=True)
    z = (h1 - mean) * jax.lax.rsqrt(var + 1e-5) * gamma_ref[...] + beta_ref[...]     # (B,H)

    # ---- SVGP predictive mean + likelihood mean + un-normalization ------------------------
    outputscale = scal_ref[0]
    inv_lsm2 = scal_ref[1]          # 1 / lengthscale_matern^2
    inv_lsr2 = scal_ref[2]          # 1 / lengthscale_rbf^2
    mean_const = scal_ref[3]
    y_std = scal_ref[4]
    y_mean = scal_ref[5]

    zu_t = zu_t_ref[...]            # (H, M)  pre-transposed inducing points
    u2 = u2_ref[...]                # (1, M)  ||Zu||^2 (precomputed)
    alpha = alpha_ref[...]          # (1, M)  (L^{-T} m)^T (precomputed)

    # one shared unscaled sqdist for both kernel components
    z2 = jnp.sum(z * z, axis=-1, keepdims=True)                   # (B, 1)
    d2 = jnp.maximum(z2 + u2 - 2.0 * mm(z, zu_t), 0.0)            # (B, M)

    d2m = d2 * inv_lsm2
    dm = jnp.sqrt(d2m)              # forward-only; clamp with eps if ever differentiated
    s5 = jnp.sqrt(5.0)
    matern = (1.0 + s5 * dm + (5.0 / 3.0) * d2m) * jnp.exp(-s5 * dm)
    rbf = jnp.exp(-0.5 * d2 * inv_lsr2)
    k_xz = outputscale * (matern + rbf)                           # (B, M)

    # K_xz @ alpha as a VPU broadcast-mul + lane reduction (avoid an N=1 MXU matmul)
    pred = jnp.sum(k_xz * alpha, axis=-1, keepdims=True) + mean_const
    out_ref[...] = pred * y_std + y_mean


# ----------------------------------------------------------------------------
# Parameter-only helpers (run once, outside the per-call hot path)
# ----------------------------------------------------------------------------
def _sqdist(a, b):
    a2 = jnp.sum(a * a, axis=-1, keepdims=True)
    b2 = jnp.sum(b * b, axis=-1, keepdims=True).T
    return jnp.maximum(a2 + b2 - 2.0 * a @ b.T, 0.0)


def _k_matern_rbf(a, b, outputscale, ls_m, ls_r):
    d2 = _sqdist(a, b)
    d2m = d2 / (ls_m ** 2)
    dm = jnp.sqrt(d2m)
    s5 = jnp.sqrt(5.0)
    matern = (1.0 + s5 * dm + (5.0 / 3.0) * d2m) * jnp.exp(-s5 * dm)
    rbf = jnp.exp(-0.5 * d2 / (ls_r ** 2))
    return outputscale * (matern + rbf)


def prepare_inference_params(raw, jitter=1e-6, pad_input_to=8):
    """One-time conversion of PyTorch-style parameters into kernel-ready operands."""
    M = raw["inducing"].shape[0]

    def fuse_gates_T(w, pad_rows=None):
        # PyTorch layout (3H, K), gate order r,z,n -> (Kp, 3H): per-gate transpose, concat on lanes.
        h = w.shape[0] // 3
        wt = jnp.concatenate([w[0:h].T, w[h:2 * h].T, w[2 * h:3 * h].T], axis=1)
        if pad_rows is not None and pad_rows > wt.shape[0]:
            wt = jnp.pad(wt, ((0, pad_rows - wt.shape[0]), (0, 0)))
        return wt

    def fuse_bias_i(bih, bhh):      # (1,3H): [b_ir+b_hr | b_iz+b_hz | b_in]
        h = bih.shape[0] // 3
        return jnp.concatenate([bih[:2 * h] + bhh[:2 * h], bih[2 * h:]])[None, :]

    def fuse_bias_h(bhh):           # (1,3H): [0 | 0 | b_hn]  (added to the recurrent projection)
        h = bhh.shape[0] // 3
        return jnp.concatenate([jnp.zeros((2 * h,), jnp.float32), bhh[2 * h:]])[None, :]

    # --- whitened SVGP setup: Kzz, Cholesky, triangular solve (input independent) -----------
    # NOTE: jitter=1e-6 matches gpytorch's float32 default; if inducing points ever cluster,
    #       raise to ~1e-4 or run this one-time step in float64.
    Zu = raw["inducing"]                                            # (M, H)
    outputscale, ls_m, ls_r = raw["outputscale"], raw["ls_matern"], raw["ls_rbf"]
    Kzz = _k_matern_rbf(Zu, Zu, outputscale, ls_m, ls_r) + jitter * jnp.eye(M, dtype=jnp.float32)
    L = jnp.linalg.cholesky(Kzz)
    alpha = jax.scipy.linalg.solve_triangular(L.T, raw["var_mean"], lower=False)    # (M, 1)

    scalars = jnp.array([outputscale, 1.0 / ls_m ** 2, 1.0 / ls_r ** 2,
                         raw["mean_const"], raw["y_std"], raw["y_mean"]], dtype=jnp.float32)

    return {
        "wih0": fuse_gates_T(raw["wih_l0"], pad_rows=pad_input_to),   # (Dp, 3H)
        "whh0": fuse_gates_T(raw["whh_l0"]),                          # (H, 3H)
        "b0i": fuse_bias_i(raw["bih_l0"], raw["bhh_l0"]),
        "b0h": fuse_bias_h(raw["bhh_l0"]),
        "wih1": fuse_gates_T(raw["wih_l1"]),
        "whh1": fuse_gates_T(raw["whh_l1"]),
        "b1i": fuse_bias_i(raw["bih_l1"], raw["bhh_l1"]),
        "b1h": fuse_bias_h(raw["bhh_l1"]),
        "ln_gamma": raw["ln_gamma"][None, :],
        "ln_beta": raw["ln_beta"][None, :],
        "zu_t": Zu.T,                                     # (H, M)
        "u2": jnp.sum(Zu * Zu, axis=-1)[None, :],         # (1, M)
        "alpha": alpha[:, 0][None, :],                    # (1, M)
        "scalars": scalars,
    }


# ----------------------------------------------------------------------------
# Forward wrapper: single pallas_call, everything resident in VMEM/SMEM
# ----------------------------------------------------------------------------
@jax.jit
def residual_model_forward(x, p):
    # x: (B, T, Din) batch-first (PyTorch convention) -> time-major flattened rows, Din padded.
    B, T, Din = x.shape
    Dp = p["wih0"].shape[0]
    x_tm = jnp.transpose(x, (1, 0, 2)).reshape(T * B, Din)
    if Dp > Din:
        x_tm = jnp.pad(x_tm, ((0, 0), (0, Dp - Din)))
    # TODO(synk): for repeated rollout calls, fold the transpose into the kernel / stack calls
    #             along a grid axis so launch overhead and this tiny XLA op are amortized.

    vmem = pl.BlockSpec(memory_space=pltpu.MemorySpace.VMEM)
    smem = pl.BlockSpec(memory_space=pltpu.MemorySpace.SMEM)
    return pl.pallas_call(
        functools.partial(fused_gru_svgp_kernel, T=T, B=B),
        out_shape=jax.ShapeDtypeStruct((B, 1), jnp.float32),
        in_specs=[vmem] * 14 + [smem],
        out_specs=vmem,
    )(x_tm,
      p["wih0"], p["whh0"], p["b0i"], p["b0h"],
      p["wih1"], p["whh1"], p["b1i"], p["b1h"],
      p["ln_gamma"], p["ln_beta"],
      p["zu_t"], p["u2"], p["alpha"], p["scalars"])


# ----------------------------------------------------------------------------
# Deterministic parameter construction + run
# ----------------------------------------------------------------------------
def make_raw_params(key, d_model=32, input_dim=6, n_inducing=16, y_mean=0.05, y_std=2.0):
    H, Din, M = d_model, input_dim, n_inducing
    ks = jax.random.split(key, 12)
    sc = 0.1
    return {
        # GRU layer 0 (PyTorch layout: (3H, Din)/(3H, H), gate order r,z,n)
        "wih_l0": sc * jax.random.normal(ks[0], (3 * H, Din), jnp.float32),
        "whh_l0": sc * jax.random.normal(ks[1], (3 * H, H), jnp.float32),
        "bih_l0": sc * jax.random.normal(ks[2], (3 * H,), jnp.float32),
        "bhh_l0": sc * jax.random.normal(ks[3], (3 * H,), jnp.float32),
        # GRU layer 1
        "wih_l1": sc * jax.random.normal(ks[4], (3 * H, H), jnp.float32),
        "whh_l1": sc * jax.random.normal(ks[5], (3 * H, H), jnp.float32),
        "bih_l1": sc * jax.random.normal(ks[6], (3 * H,), jnp.float32),
        "bhh_l1": sc * jax.random.normal(ks[7], (3 * H,), jnp.float32),
        # LayerNorm (torch default init)
        "ln_gamma": jnp.ones((H,), jnp.float32),
        "ln_beta": jnp.zeros((H,), jnp.float32),
        # SVGP
        "inducing": jax.random.normal(ks[8], (M, H), jnp.float32),        # Z = randn(M, d_model)
        "var_mean": sc * jax.random.normal(ks[9], (M, 1), jnp.float32),   # variational mean m
        # softplus(0) ~= 0.6931 are the gpytorch defaults for raw params = 0
        "outputscale": 0.6931472,
        "ls_matern": 0.6931472,
        "ls_rbf": 0.6931472,
        "mean_const": 0.0,
        "y_std": float(y_std),
        "y_mean": float(y_mean),
    }


if __name__ == "__main__":
    key = jax.random.PRNGKey(0)
    k_x, k_p = jax.random.split(key)

    B, T, Din, d_model, n_inducing = 2, 8, 6, 32, 16
    x = jax.random.normal(k_x, (B, T, Din), jnp.float32)   # (batch, seq, 6) vehicle states

    raw = make_raw_params(k_p, d_model=d_model, input_dim=Din, n_inducing=n_inducing)
    prepared = prepare_inference_params(raw)                # parameter-only setup, done once

    out = residual_model_forward(x, prepared)
    out = jax.block_until_ready(out)
    assert out.shape == (B, 1) and out.dtype == jnp.float32
    assert bool(jnp.all(jnp.isfinite(out)))
    print("KERNEL_OK")
</pallas_src>

<mosaic_0001>
module attributes {stable_mosaic.version = 11 : i64} {
  func.func @fused_gru_svgp_kernel(%arg0: memref<16x8xf32, #tpu.memory_space<vmem>>, %arg1: memref<8x96xf32, #tpu.memory_space<vmem>>, %arg2: memref<32x96xf32, #tpu.memory_space<vmem>>, %arg3: memref<1x96xf32, #tpu.memory_space<vmem>>, %arg4: memref<1x96xf32, #tpu.memory_space<vmem>>, %arg5: memref<32x96xf32, #tpu.memory_space<vmem>>, %arg6: memref<32x96xf32, #tpu.memory_space<vmem>>, %arg7: memref<1x96xf32, #tpu.memory_space<vmem>>, %arg8: memref<1x96xf32, #tpu.memory_space<vmem>>, %arg9: memref<1x32xf32, #tpu.memory_space<vmem>>, %arg10: memref<1x32xf32, #tpu.memory_space<vmem>>, %arg11: memref<32x16xf32, #tpu.memory_space<vmem>>, %arg12: memref<1x16xf32, #tpu.memory_space<vmem>>, %arg13: memref<1x16xf32, #tpu.memory_space<vmem>>, %arg14: memref<6xf32, #tpu.memory_space<smem>>, %arg15: memref<2x1xf32, #tpu.memory_space<vmem>>) attributes {dimension_semantics = [], scalar_prefetch = 0 : i64, scratch_operands = 0 : i64, tpu.core_type = #tpu.core_type<tc>} {
    %c0 = arith.constant 0 : index
    %c0_0 = arith.constant 0 : index
    %0 = vector.load %arg2[%c0, %c0_0] : memref<32x96xf32, #tpu.memory_space<vmem>>, vector<32x96xf32>
    %c0_1 = arith.constant 0 : index
    %c0_2 = arith.constant 0 : index
    %1 = vector.load %arg6[%c0_1, %c0_2] : memref<32x96xf32, #tpu.memory_space<vmem>>, vector<32x96xf32>
    %c0_3 = arith.constant 0 : index
    %c0_4 = arith.constant 0 : index
    %2 = vector.load %arg5[%c0_3, %c0_4] : memref<32x96xf32, #tpu.memory_space<vmem>>, vector<32x96xf32>
    %c0_5 = arith.constant 0 : index
    %c0_6 = arith.constant 0 : index
    %3 = vector.load %arg4[%c0_5, %c0_6] : memref<1x96xf32, #tpu.memory_space<vmem>>, vector<1x96xf32>
    %c0_7 = arith.constant 0 : index
    %c0_8 = arith.constant 0 : index
    %4 = vector.load %arg7[%c0_7, %c0_8] : memref<1x96xf32, #tpu.memory_space<vmem>>, vector<1x96xf32>
    %c0_9 = arith.constant 0 : index
    %c0_10 = arith.constant 0 : index
    %5 = vector.load %arg8[%c0_9, %c0_10] : memref<1x96xf32, #tpu.memory_space<vmem>>, vector<1x96xf32>
    %c0_11 = arith.constant 0 : index
    %c0_12 = arith.constant 0 : index
    %6 = vector.load %arg0[%c0_11, %c0_12] : memref<16x8xf32, #tpu.memory_space<vmem>>, vector<16x8xf32>
    %c0_13 = arith.constant 0 : index
    %c0_14 = arith.constant 0 : index
    %7 = vector.load %arg1[%c0_13, %c0_14] : memref<8x96xf32, #tpu.memory_space<vmem>>, vector<8x96xf32>
    %cst = arith.constant dense<0.000000e+00> : vector<16x96xf32>
    %8 = tpu.matmul %6, %7, %cst {dimension_numbers = #tpu.dot_dimension_numbers<[1], [0], [0], [1], [0, 0, 1, 1], [], []>} : vector<16x8xf32>, vector<8x96xf32>, vector<16x96xf32> -> vector<16x96xf32>
    %c0_15 = arith.constant 0 : index
    %c0_16 = arith.constant 0 : index
    %9 = vector.load %arg3[%c0_15, %c0_16] : memref<1x96xf32, #tpu.memory_space<vmem>>, vector<1x96xf32>
    %10 = vector.broadcast %9 : vector<1x96xf32> to vector<16x96xf32>
    %11 = arith.addf %8, %10 : vector<16x96xf32>
    %cst_17 = arith.constant 0.000000e+00 : f32
    %12 = vector.broadcast %cst_17 : f32 to vector<2x32xf32>
    %cst_18 = arith.constant 0.000000e+00 : f32
    %13 = vector.broadcast %cst_18 : f32 to vector<2x32xf32>
    %14 = vector.extract_strided_slice %11 {offsets = [0, 0], sizes = [2, 96], strides = [1, 1]} : vector<16x96xf32> to vector<2x96xf32>
    %cst_19 = arith.constant dense<0.000000e+00> : vector<2x96xf32>
    %15 = tpu.matmul %12, %0, %cst_19 {dimension_numbers = #tpu.dot_dimension_numbers<[1], [0], [0], [1], [0, 0, 1, 1], [], []>} : vector<2x32xf32>, vector<32x96xf32>, vector<2x96xf32> -> vector<2x96xf32>
    %16 = vector.broadcast %3 : vector<1x96xf32> to vector<2x96xf32>
    %17 = arith.addf %15, %16 : vector<2x96xf32>
    %18 = vector.extract_strided_slice %14 {offsets = [0, 0], sizes = [2, 64], strides = [1, 1]} : vector<2x96xf32> to vector<2x64xf32>
    %19 = vector.extract_strided_slice %17 {offsets = [0, 0], sizes = [2, 64], strides = [1, 1]} : vector<2x96xf32> to vector<2x64xf32>
    %20 = arith.addf %18, %19 : vector<2x64xf32>
    %21 = arith.negf %20 : vector<2x64xf32>
    %22 = math.exp %21 : vector<2x64xf32>
    %cst_20 = arith.constant 1.000000e+00 : f32
    %23 = vector.broadcast %cst_20 : f32 to vector<2x64xf32>
    %24 = arith.addf %23, %22 : vector<2x64xf32>
    %25 = arith.divf %23, %24 : vector<2x64xf32>
    %26 = vector.extract_strided_slice %25 {offsets = [0, 0], sizes = [2, 32], strides = [1, 1]} : vector<2x64xf32> to vector<2x32xf32>
    %27 = vector.extract_strided_slice %25 {offsets = [0, 32], sizes = [2, 32], strides = [1, 1]} : vector<2x64xf32> to vector<2x32xf32>
    %28 = vector.extract_strided_slice %14 {offsets = [0, 64], sizes = [2, 32], strides = [1, 1]} : vector<2x96xf32> to vector<2x32xf32>
    %29 = vector.extract_strided_slice %17 {offsets = [0, 64], sizes = [2, 32], strides = [1, 1]} : vector<2x96xf32> to vector<2x32xf32>
    %30 = arith.mulf %26, %29 : vector<2x32xf32>
    %31 = arith.addf %28, %30 : vector<2x32xf32>
    %32 = math.tanh %31 : vector<2x32xf32>
    %cst_21 = arith.constant 1.000000e+00 : f32
    %33 = vector.broadcast %cst_21 : f32 to vector<2x32xf32>
    %34 = arith.subf %33, %27 : vector<2x32xf32>
    %35 = arith.mulf %34, %32 : vector<2x32xf32>
    %36 = arith.mulf %27, %12 : vector<2x32xf32>
    %37 = arith.addf %35, %36 : vector<2x32xf32>
    %cst_22 = arith.constant dense<0.000000e+00> : vector<2x96xf32>
    %38 = tpu.matmul %37, %2, %cst_22 {dimension_numbers = #tpu.dot_dimension_numbers<[1], [0], [0], [1], [0, 0, 1, 1], [], []>} : vector<2x32xf32>, vector<32x96xf32>, vector<2x96xf32> -> vector<2x96xf32>
    %39 = vector.broadcast %4 : vector<1x96xf32> to vector<2x96xf32>
    %40 = arith.addf %38, %39 : vector<2x96xf32>
    %cst_23 = arith.constant dense<0.000000e+00> : vector<2x96xf32>
    %41 = tpu.matmul %13, %1, %cst_23 {dimension_numbers = #tpu.dot_dimension_numbers<[1], [0], [0], [1], [0, 0, 1, 1], [], []>} : vector<2x32xf32>, vector<32x96xf32>, vector<2x96xf32> -> vector<2x96xf32>
    %42 = vector.broadcast %5 : vector<1x96xf32> to vector<2x96xf32>
    %43 = arith.addf %41, %42 : vector<2x96xf32>
    %44 = vector.extract_strided_slice %40 {offsets = [0, 0], sizes = [2, 64], strides = [1, 1]} : vector<2x96xf32> to vector<2x64xf32>
    %45 = vector.extract_strided_slice %43 {offsets = [0, 0], sizes = [2, 64], strides = [1, 1]} : vector<2x96xf32> to vector<2x64xf32>
    %46 = arith.addf %44, %45 : vector<2x64xf32>
    %47 = arith.negf %46 : vector<2x64xf32>
    %48 = math.exp %47 : vector<2x64xf32>
    %cst_24 = arith.constant 1.000000e+00 : f32
    %49 = vector.broadcast %cst_24 : f32 to vector<2x64xf32>
    %50 = arith.addf %49, %48 : vector<2x64xf32>
    %51 = arith.divf %49, %50 : vector<2x64xf32>
    %52 = vector.extract_strided_slice %51 {offsets = [0, 0], sizes = [2, 32], strides = [1, 1]} : vector<2x64xf32> to vector<2x32xf32>
    %53 = vector.extract_strided_slice %51 {offsets = [0, 32], sizes = [2, 32], strides = [1, 1]} : vector<2x64xf32> to vector<2x32xf32>
    %54 = vector.extract_strided_slice %40 {offsets = [0, 64], sizes = [2, 32], strides = [1, 1]} : vector<2x96xf32> to vector<2x32xf32>
    %55 = vector.extract_strided_slice %43 {offsets = [0, 64], sizes = [2, 32], strides = [1, 1]} : vector<2x96xf32> to vector<2x32xf32>
    %56 = arith.mulf %52, %55 : vector<2x32xf32>
    %57 = arith.addf %54, %56 : vector<2x32xf32>
    %58 = math.tanh %57 : vector<2x32xf32>
    %cst_25 = arith.constant 1.000000e+00 : f32
    %59 = vector.broadcast %cst_25 : f32 to vector<2x32xf32>
    %60 = arith.subf %59, %53 : vector<2x32xf32>
    %61 = arith.mulf %60, %58 : vector<2x32xf32>
    %62 = arith.mulf %53, %13 : vector<2x32xf32>
    %63 = arith.addf %61, %62 : vector<2x32xf32>
    %64 = vector.extract_strided_slice %11 {offsets = [2, 0], sizes = [2, 96], strides = [1, 1]} : vector<16x96xf32> to vector<2x96xf32>
    %cst_26 = arith.constant dense<0.000000e+00> : vector<2x96xf32>
    %65 = tpu.matmul %37, %0, %cst_26 {dimension_numbers = #tpu.dot_dimension_numbers<[1], [0], [0], [1], [0, 0, 1, 1], [], []>} : vector<2x32xf32>, vector<32x96xf32>, vector<2x96xf32> -> vector<2x96xf32>
    %66 = vector.broadcast %3 : vector<1x96xf32> to vector<2x96xf32>
    %67 = arith.addf %65, %66 : vector<2x96xf32>
    %68 = vector.extract_strided_slice %64 {offsets = [0, 0], sizes = [2, 64], strides = [1, 1]} : vector<2x96xf32> to vector<2x64xf32>
    %69 = vector.extract_strided_slice %67 {offsets = [0, 0], sizes = [2, 64], strides = [1, 1]} : vector<2x96xf32> to vector<2x64xf32>
    %70 = arith.addf %68, %69 : vector<2x64xf32>
    %71 = arith.negf %70 : vector<2x64xf32>
    %72 = math.exp %71 : vector<2x64xf32>
    %cst_27 = arith.constant 1.000000e+00 : f32
    %73 = vector.broadcast %cst_27 : f32 to vector<2x64xf32>
    %74 = arith.addf %73, %72 : vector<2x64xf32>
    %75 = arith.divf %73, %74 : vector<2x64xf32>
    %76 = vector.extract_strided_slice %75 {offsets = [0, 0], sizes = [2, 32], strides = [1, 1]} : vector<2x64xf32> to vector<2x32xf32>
    %77 = vector.extract_strided_slice %75 {offsets = [0, 32], sizes = [2, 32], strides = [1, 1]} : vector<2x64xf32> to vector<2x32xf32>
    %78 = vector.extract_strided_slice %64 {offsets = [0, 64], sizes = [2, 32], strides = [1, 1]} : vector<2x96xf32> to vector<2x32xf32>
    %79 = vector.extract_strided_slice %67 {offsets = [0, 64], sizes = [2, 32], strides = [1, 1]} : vector<2x96xf32> to vector<2x32xf32>
    %80 = arith.mulf %76, %79 : vector<2x32xf32>
    %81 = arith.addf %78, %80 : vector<2x32xf32>
    %82 = math.tanh %81 : vector<2x32xf32>
    %cst_28 = arith.constant 1.000000e+00 : f32
    %83 = vector.broadcast %cst_28 : f32 to vector<2x32xf32>
    %84 = arith.subf %83, %77 : vector<2x32xf32>
    %85 = arith.mulf %84, %82 : vector<2x32xf32>
    %86 = arith.mulf %77, %37 : vector<2x32xf32>
    %87 = arith.addf %85, %86 : vector<2x32xf32>
    %cst_29 = arith.constant dense<0.000000e+00> : vector<2x96xf32>
    %88 = tpu.matmul %87, %2, %cst_29 {dimension_numbers = #tpu.dot_dimension_numbers<[1], [0], [0], [1], [0, 0, 1, 1], [], []>} : vector<2x32xf32>, vector<32x96xf32>, vector<2x96xf32> -> vector<2x96xf32>
    %89 = vector.broadcast %4 : vector<1x96xf32> to vector<2x96xf32>
    %90 = arith.addf %88, %89 : vector<2x96xf32>
    %cst_30 = arith.constant dense<0.000000e+00> : vector<2x96xf32>
    %91 = tpu.matmul %63, %1, %cst_30 {dimension_numbers = #tpu.dot_dimension_numbers<[1], [0], [0], [1], [0, 0, 1, 1], [], []>} : vector<2x32xf32>, vector<32x96xf32>, vector<2x96xf32> -> vector<2x96xf32>
    %92 = vector.broadcast %5 : vector<1x96xf32> to vector<2x96xf32>
    %93 = arith.addf %91, %92 : vector<2x96xf32>
    %94 = vector.extract_strided_slice %90 {offsets = [0, 0], sizes = [2, 64], strides = [1, 1]} : vector<2x96xf32> to vector<2x64xf32>
    %95 = vector.extract_strided_slice %93 {offsets = [0, 0], sizes = [2, 64], strides = [1, 1]} : vector<2x96xf32> to vector<2x64xf32>
    %96 = arith.addf %94, %95 : vector<2x64xf32>
    %97 = arith.negf %96 : vector<2x64xf32>
    %98 = math.exp %97 : vector<2x64xf32>
    %cst_31 = arith.constant 1.000000e+00 : f32
    %99 = vector.broadcast %cst_31 : f32 to vector<2x64xf32>
    %100 = arith.addf %99, %98 : vector<2x64xf32>
    %101 = arith.divf %99, %100 : vector<2x64xf32>
    %102 = vector.extract_strided_slice %101 {offsets = [0, 0], sizes = [2, 32], strides = [1, 1]} : vector<2x64xf32> to vector<2x32xf32>
    %103 = vector.extract_strided_slice %101 {offsets = [0, 32], sizes = [2, 32], strides = [1, 1]} : vector<2x64xf32> to vector<2x32xf32>
    %104 = vector.extract_strided_slice %90 {offsets = [0, 64], sizes = [2, 32], strides = [1, 1]} : vector<2x96xf32> to vector<2x32xf32>
    %105 = vector.extract_strided_slice %93 {offsets = [0, 64], sizes = [2, 32], strides = [1, 1]} : vector<2x96xf32> to vector<2x32xf32>
    %106 = arith.mulf %102, %105 : vector<2x32xf32>
    %107 = arith.addf %104, %106 : vector<2x32xf32>
    %108 = math.tanh %107 : vector<2x32xf32>
    %cst_32 = arith.constant 1.000000e+00 : f32
    %109 = vector.broadcast %cst_32 : f32 to vector<2x32xf32>
    %110 = arith.subf %109, %103 : vector<2x32xf32>
    %111 = arith.mulf %110, %108 : vector<2x32xf32>
    %112 = arith.mulf %103, %63 : vector<2x32xf32>
    %113 = arith.addf %111, %112 : vector<2x32xf32>
    %114 = vector.extract_strided_slice %11 {offsets = [4, 0], sizes = [2, 96], strides = [1, 1]} : vector<16x96xf32> to vector<2x96xf32>
    %cst_33 = arith.constant dense<0.000000e+00> : vector<2x96xf32>
    %115 = tpu.matmul %87, %0, %cst_33 {dimension_numbers = #tpu.dot_dimension_numbers<[1], [0], [0], [1], [0, 0, 1, 1], [], []>} : vector<2x32xf32>, vector<32x96xf32>, vector<2x96xf32> -> vector<2x96xf32>
    %116 = vector.broadcast %3 : vector<1x96xf32> to vector<2x96xf32>
    %117 = arith.addf %115, %116 : vector<2x96xf32>
    %118 = vector.extract_strided_slice %114 {offsets = [0, 0], sizes = [2, 64], strides = [1, 1]} : vector<2x96xf32> to vector<2x64xf32>
    %119 = vector.extract_strided_slice %117 {offsets = [0, 0], sizes = [2, 64], strides = [1, 1]} : vector<2x96xf32> to vector<2x64xf32>
    %120 = arith.addf %118, %119 : vector<2x64xf32>
    %121 = arith.negf %120 : vector<2x64xf32>
    %122 = math.exp %121 : vector<2x64xf32>
    %cst_34 = arith.constant 1.000000e+00 : f32
    %123 = vector.broadcast %cst_34 : f32 to vector<2x64xf32>
    %124 = arith.addf %123, %122 : vector<2x64xf32>
    %125 = arith.divf %123, %124 : vector<2x64xf32>
    %126 = vector.extract_strided_slice %125 {offsets = [0, 0], sizes = [2, 32], strides = [1, 1]} : vector<2x64xf32> to vector<2x32xf32>
    %127 = vector.extract_strided_slice %125 {offsets = [0, 32], sizes = [2, 32], strides = [1, 1]} : vector<2x64xf32> to vector<2x32xf32>
    %128 = vector.extract_strided_slice %114 {offsets = [0, 64], sizes = [2, 32], strides = [1, 1]} : vector<2x96xf32> to vector<2x32xf32>
    %129 = vector.extract_strided_slice %117 {offsets = [0, 64], sizes = [2, 32], strides = [1, 1]} : vector<2x96xf32> to vector<2x32xf32>
    %130 = arith.mulf %126, %129 : vector<2x32xf32>
    %131 = arith.addf %128, %130 : vector<2x32xf32>
    %132 = math.tanh %131 : vector<2x32xf32>
    %cst_35 = arith.constant 1.000000e+00 : f32
    %133 = vector.broadcast %cst_35 : f32 to vector<2x32xf32>
    %134 = arith.subf %133, %127 : vector<2x32xf32>
    %135 = arith.mulf %134, %132 : vector<2x32xf32>
    %136 = arith.mulf %127, %87 : vector<2x32xf32>
    %137 = arith.addf %135, %136 : vector<2x32xf32>
    %cst_36 = arith.constant dense<0.000000e+00> : vector<2x96xf32>
    %138 = tpu.matmul %137, %2, %cst_36 {dimension_numbers = #tpu.dot_dimension_numbers<[1], [0], [0], [1], [0, 0, 1, 1], [], []>} : vector<2x32xf32>, vector<32x96xf32>, vector<2x96xf32> -> vector<2x96xf32>
    %139 = vector.broadcast %4 : vector<1x96xf32> to vector<2x96xf32>
    %140 = arith.addf %138, %139 : vector<2x96xf32>
    %cst_37 = arith.constant dense<0.000000e+00> : vector<2x96xf32>
    %141 = tpu.matmul %113, %1, %cst_37 {dimension_numbers = #tpu.dot_dimension_numbers<[1], [0], [0], [1], [0, 0, 1, 1], [], []>} : vector<2x32xf32>, vector<32x96xf32>, vector<2x96xf32> -> vector<2x96xf32>
    %142 = vector.broadcast %5 : vector<1x96xf32> to vector<2x96xf32>
    %143 = arith.addf %141, %142 : vector<2x96xf32>
    %144 = vector.extract_strided_slice %140 {offsets = [0, 0], sizes = [2, 64], strides = [1, 1]} : vector<2x96xf32> to vector<2x64xf32>
    %145 = vector.extract_strided_slice %143 {offsets = [0, 0], sizes = [2, 64], strides = [1, 1]} : vector<2x96xf32> to vector<2x64xf32>
    %146 = arith.addf %144, %145 : vector<2x64xf32>
    %147 = arith.negf %146 : vector<2x64xf32>
    %148 = math.exp %147 : vector<2x64xf32>
    %cst_38 = arith.constant 1.000000e+00 : f32
    %149 = vector.broadcast %cst_38 : f32 to vector<2x64xf32>
    %150 = arith.addf %149, %148 : vector<2x64xf32>
    %151 = arith.divf %149, %150 : vector<2x64xf32>
    %152 = vector.extract_strided_slice %151 {offsets = [0, 0], sizes = [2, 32], strides = [1, 1]} : vector<2x64xf32> to vector<2x32xf32>
    %153 = vector.extract_strided_slice %151 {offsets = [0, 32], sizes = [2, 32], strides = [1, 1]} : vector<2x64xf32> to vector<2x32xf32>
    %154 = vector.extract_strided_slice %140 {offsets = [0, 64], sizes = [2, 32], strides = [1, 1]} : vector<2x96xf32> to vector<2x32xf32>
    %155 = vector.extract_strided_slice %143 {offsets = [0, 64], sizes = [2, 32], strides = [1, 1]} : vector<2x96xf32> to vector<2x32xf32>
    %156 = arith.mulf %152, %155 : vector<2x32xf32>
    %157 = arith.addf %154, %156 : vector<2x32xf32>
    %158 = math.tanh %157 : vector<2x32xf32>
    %cst_39 = arith.constant 1.000000e+00 : f32
    %159 = vector.broadcast %cst_39 : f32 to vector<2x32xf32>
    %160 = arith.subf %159, %153 : vector<2x32xf32>
    %161 = arith.mulf %160, %158 : vector<2x32xf32>
    %162 = arith.mulf %153, %113 : vector<2x32xf32>
    %163 = arith.addf %161, %162 : vector<2x32xf32>
    %164 = vector.extract_strided_slice %11 {offsets = [6, 0], sizes = [2, 96], strides = [1, 1]} : vector<16x96xf32> to vector<2x96xf32>
    %cst_40 = arith.constant dense<0.000000e+00> : vector<2x96xf32>
    %165 = tpu.matmul %137, %0, %cst_40 {dimension_numbers = #tpu.dot_dimension_numbers<[1], [0], [0], [1], [0, 0, 1, 1], [], []>} : vector<2x32xf32>, vector<32x96xf32>, vector<2x96xf32> -> vector<2x96xf32>
    %166 = vector.broadcast %3 : vector<1x96xf32> to vector<2x96xf32>
    %167 = arith.addf %165, %166 : vector<2x96xf32>
    %168 = vector.extract_strided_slice %164 {offsets = [0, 0], sizes = [2, 64], strides = [1, 1]} : vector<2x96xf32> to vector<2x64xf32>
    %169 = vector.extract_strided_slice %167 {offsets = [0, 0], sizes = [2, 64], strides = [1, 1]} : vector<2x96xf32> to vector<2x64xf32>
    %170 = arith.addf %168, %169 : vector<2x64xf32>
    %171 = arith.negf %170 : vector<2x64xf32>
    %172 = math.exp %171 : vector<2x64xf32>
    %cst_41 = arith.constant 1.000000e+00 : f32
    %173 = vector.broadcast %cst_41 : f32 to vector<2x64xf32>
    %174 = arith.addf %173, %172 : vector<2x64xf32>
    %175 = arith.divf %173, %174 : vector<2x64xf32>
    %176 = vector.extract_strided_slice %175 {offsets = [0, 0], sizes = [2, 32], strides = [1, 1]} : vector<2x64xf32> to vector<2x32xf32>
    %177 = vector.extract_strided_slice %175 {offsets = [0, 32], sizes = [2, 32], strides = [1, 1]} : vector<2x64xf32> to vector<2x32xf32>
    %178 = vector.extract_strided_slice %164 {offsets = [0, 64], sizes = [2, 32], strides = [1, 1]} : vector<2x96xf32> to vector<2x32xf32>
    %179 = vector.extract_strided_slice %167 {offsets = [0, 64], sizes = [2, 32], strides = [1, 1]} : vector<2x96xf32> to vector<2x32xf32>
    %180 = arith.mulf %176, %179 : vector<2x32xf32>
    %181 = arith.addf %178, %180 : vector<2x32xf32>
    %182 = math.tanh %181 : vector<2x32xf32>
    %cst_42 = arith.constant 1.000000e+00 : f32
    %183 = vector.broadcast %cst_42 : f32 to vector<2x32xf32>
    %184 = arith.subf %183, %177 : vector<2x32xf32>
    %185 = arith.mulf %184, %182 : vector<2x32xf32>
    %186 = arith.mulf %177, %137 : vector<2x32xf32>
    %187 = arith.addf %185, %186 : vector<2x32xf32>
    %cst_43 = arith.constant dense<0.000000e+00> : vector<2x96xf32>
    %188 = tpu.matmul %187, %2, %cst_43 {dimension_numbers = #tpu.dot_dimension_numbers<[1], [0], [0], [1], [0, 0, 1, 1], [], []>} : vector<2x32xf32>, vector<32x96xf32>, vector<2x96xf32> -> vector<2x96xf32>
    %189 = vector.broadcast %4 : vector<1x96xf32> to vector<2x96xf32>
    %190 = arith.addf %188, %189 : vector<2x96xf32>
    %cst_44 = arith.constant dense<0.000000e+00> : vector<2x96xf32>
    %191 = tpu.matmul %163, %1, %cst_44 {dimension_numbers = #tpu.dot_dimension_numbers<[1], [0], [0], [1], [0, 0, 1, 1], [], []>} : vector<2x32xf32>, vector<32x96xf32>, vector<2x96xf32> -> vector<2x96xf32>
    %192 = vector.broadcast %5 : vector<1x96xf32> to vector<2x96xf32>
    %193 = arith.addf %191, %192 : vector<2x96xf32>
    %194 = vector.extract_strided_slice %190 {offsets = [0, 0], sizes = [2, 64], strides = [1, 1]} : vector<2x96xf32> to vector<2x64xf32>
    %195 = vector.extract_strided_slice %193 {offsets = [0, 0], sizes = [2, 64], strides = [1, 1]} : vector<2x96xf32> to vector<2x64xf32>
    %196 = arith.addf %194, %195 : vector<2x64xf32>
    %197 = arith.negf %196 : vector<2x64xf32>
    %198 = math.exp %197 : vector<2x64xf32>
    %cst_45 = arith.constant 1.000000e+00 : f32
    %199 = vector.broadcast %cst_45 : f32 to vector<2x64xf32>
    %200 = arith.addf %199, %198 : vector<2x64xf32>
    %201 = arith.divf %199, %200 : vector<2x64xf32>
    %202 = vector.extract_strided_slice %201 {offsets = [0, 0], sizes = [2, 32], strides = [1, 1]} : vector<2x64xf32> to vector<2x32xf32>
    %203 = vector.extract_strided_slice %201 {offsets = [0, 32], sizes = [2, 32], strides = [1, 1]} : vector<2x64xf32> to vector<2x32xf32>
    %204 = vector.extract_strided_slice %190 {offsets = [0, 64], sizes = [2, 32], strides = [1, 1]} : vector<2x96xf32> to vector<2x32xf32>
    %205 = vector.extract_strided_slice %193 {offsets = [0, 64], sizes = [2, 32], strides = [1, 1]} : vector<2x96xf32> to vector<2x32xf32>
    %206 = arith.mulf %202, %205 : vector<2x32xf32>
    %207 = arith.addf %204, %206 : vector<2x32xf32>
    %208 = math.tanh %207 : vector<2x32xf32>
    %cst_46 = arith.constant 1.000000e+00 : f32
    %209 = vector.broadcast %cst_46 : f32 to vector<2x32xf32>
    %210 = arith.subf %209, %203 : vector<2x32xf32>
    %211 = arith.mulf %210, %208 : vector<2x32xf32>
    %212 = arith.mulf %203, %163 : vector<2x32xf32>
    %213 = arith.addf %211, %212 : vector<2x32xf32>
    %214 = vector.extract_strided_slice %11 {offsets = [8, 0], sizes = [2, 96], strides = [1, 1]} : vector<16x96xf32> to vector<2x96xf32>
    %cst_47 = arith.constant dense<0.000000e+00> : vector<2x96xf32>
    %215 = tpu.matmul %187, %0, %cst_47 {dimension_numbers = #tpu.dot_dimension_numbers<[1], [0], [0], [1], [0, 0, 1, 1], [], []>} : vector<2x32xf32>, vector<32x96xf32>, vector<2x96xf32> -> vector<2x96xf32>
    %216 = vector.broadcast %3 : vector<1x96xf32> to vector<2x96xf32>
    %217 = arith.addf %215, %216 : vector<2x96xf32>
    %218 = vector.extract_strided_slice %214 {offsets = [0, 0], sizes = [2, 64], strides = [1, 1]} : vector<2x96xf32> to vector<2x64xf32>
    %219 = vector.extract_strided_slice %217 {offsets = [0, 0], sizes = [2, 64], strides = [1, 1]} : vector<2x96xf32> to vector<2x64xf32>
    %220 = arith.addf %218, %219 : vector<2x64xf32>
    %221 = arith.negf %220 : vector<2x64xf32>
    %222 = math.exp %221 : vector<2x64xf32>
    %cst_48 = arith.constant 1.000000e+00 : f32
    %223 = vector.broadcast %cst_48 : f32 to vector<2x64xf32>
    %224 = arith.addf %223, %222 : vector<2x64xf32>
    %225 = arith.divf %223, %224 : vector<2x64xf32>
    %226 = vector.extract_strided_slice %225 {offsets = [0, 0], sizes = [2, 32], strides = [1, 1]} : vector<2x64xf32> to vector<2x32xf32>
    %227 = vector.extract_strided_slice %225 {offsets = [0, 32], sizes = [2, 32], strides = [1, 1]} : vector<2x64xf32> to vector<2x32xf32>
    %228 = vector.extract_strided_slice %214 {offsets = [0, 64], sizes = [2, 32], strides = [1, 1]} : vector<2x96xf32> to vector<2x32xf32>
    %229 = vector.extract_strided_slice %217 {offsets = [0, 64], sizes = [2, 32], strides = [1, 1]} : vector<2x96xf32> to vector<2x32xf32>
    %230 = arith.mulf %226, %229 : vector<2x32xf32>
    %231 = arith.addf %228, %230 : vector<2x32xf32>
    %232 = math.tanh %231 : vector<2x32xf32>
    %cst_49 = arith.constant 1.000000e+00 : f32
    %233 = vector.broadcast %cst_49 : f32 to vector<2x32xf32>
    %234 = arith.subf %233, %227 : vector<2x32xf32>
    %235 = arith.mulf %234, %232 : vector<2x32xf32>
    %236 = arith.mulf %227, %187 : vector<2x32xf32>
    %237 = arith.addf %235, %236 : vector<2x32xf32>
    %cst_50 = arith.constant dense<0.000000e+00> : vector<2x96xf32>
    %238 = tpu.matmul %237, %2, %cst_50 {dimension_numbers = #tpu.dot_dimension_numbers<[1], [0], [0], [1], [0, 0, 1, 1], [], []>} : vector<2x32xf32>, vector<32x96xf32>, vector<2x96xf32> -> vector<2x96xf32>
    %239 = vector.broadcast %4 : vector<1x96xf32> to vector<2x96xf32>
    %240 = arith.addf %238, %239 : vector<2x96xf32>
    %cst_51 = arith.constant dense<0.000000e+00> : vector<2x96xf32>
    %241 = tpu.matmul %213, %1, %cst_51 {dimension_numbers = #tpu.dot_dimension_numbers<[1], [0], [0], [1], [0, 0, 1, 1], [], []>} : vector<2x32xf32>, vector<32x96xf32>, vector<2x96xf32> -> vector<2x96xf32>
    %242 = vector.broadcast %5 : vector<1x96xf32> to vector<2x96xf32>
    %243 = arith.addf %241, %242 : vector<2x96xf32>
    %244 = vector.extract_strided_slice %240 {offsets = [0, 0], sizes = [2, 64], strides = [1, 1]} : vector<2x96xf32> to vector<2x64xf32>
    %245 = vector.extract_strided_slice %243 {offsets = [0, 0], sizes = [2, 64], strides = [1, 1]} : vector<2x96xf32> to vector<2x64xf32>
    %246 = arith.addf %244, %245 : vector<2x64xf32>
    %247 = arith.negf %246 : vector<2x64xf32>
    %248 = math.exp %247 : vector<2x64xf32>
    %cst_52 = arith.constant 1.000000e+00 : f32
    %249 = vector.broadcast %cst_52 : f32 to vector<2x64xf32>
    %250 = arith.addf %249, %248 : vector<2x64xf32>
    %251 = arith.divf %249, %250 : vector<2x64xf32>
    %252 = vector.extract_strided_slice %251 {offsets = [0, 0], sizes = [2, 32], strides = [1, 1]} : vector<2x64xf32> to vector<2x32xf32>
    %253 = vector.extract_strided_slice %251 {offsets = [0, 32], sizes = [2, 32], strides = [1, 1]} : vector<2x64xf32> to vector<2x32xf32>
    %254 = vector.extract_strided_slice %240 {offsets = [0, 64], sizes = [2, 32], strides = [1, 1]} : vector<2x96xf32> to vector<2x32xf32>
    %255 = vector.extract_strided_slice %243 {offsets = [0, 64], sizes = [2, 32], strides = [1, 1]} : vector<2x96xf32> to vector<2x32xf32>
    %256 = arith.mulf %252, %255 : vector<2x32xf32>
    %257 = arith.addf %254, %256 : vector<2x32xf32>
    %258 = math.tanh %257 : vector<2x32xf32>
    %cst_53 = arith.constant 1.000000e+00 : f32
    %259 = vector.broadcast %cst_53 : f32 to vector<2x32xf32>
    %260 = arith.subf %259, %253 : vector<2x32xf32>
    %261 = arith.mulf %260, %258 : vector<2x32xf32>
    %262 = arith.mulf %253, %213 : vector<2x32xf32>
    %263 = arith.addf %261, %262 : vector<2x32xf32>
    %264 = vector.extract_strided_slice %11 {offsets = [10, 0], sizes = [2, 96], strides = [1, 1]} : vector<16x96xf32> to vector<2x96xf32>
    %cst_54 = arith.constant dense<0.000000e+00> : vector<2x96xf32>
    %265 = tpu.matmul %237, %0, %cst_54 {dimension_numbers = #tpu.dot_dimension_numbers<[1], [0], [0], [1], [0, 0, 1, 1], [], []>} : vector<2x32xf32>, vector<32x96xf32>, vector<2x96xf32> -> vector<2x96xf32>
    %266 = vector.broadcast %3 : vector<1x96xf32> to vector<2x96xf32>
    %267 = arith.addf %265, %266 : vector<2x96xf32>
    %268 = vector.extract_strided_slice %264 {offsets = [0, 0], sizes = [2, 64], strides = [1, 1]} : vector<2x96xf32> to vector<2x64xf32>
    %269 = vector.extract_strided_slice %267 {offsets = [0, 0], sizes = [2, 64], strides = [1, 1]} : vector<2x96xf32> to vector<2x64xf32>
    %270 = arith.addf %268, %269 : vector<2x64xf32>
    %271 = arith.negf %270 : vector<2x64xf32>
    %272 = math.exp %271 : vector<2x64xf32>
    %cst_55 = arith.constant 1.000000e+00 : f32
    %273 = vector.broadcast %cst_55 : f32 to vector<2x64xf32>
    %274 = arith.addf %273, %272 : vector<2x64xf32>
    %275 = arith.divf %273, %274 : vector<2x64xf32>
    %276 = vector.extract_strided_slice %275 {offsets = [0, 0], sizes = [2, 32], strides = [1, 1]} : vector<2x64xf32> to vector<2x32xf32>
    %277 = vector.extract_strided_slice %275 {offsets = [0, 32], sizes = [2, 32], strides = [1, 1]} : vector<2x64xf32> to vector<2x32xf32>
    %278 = vector.extract_strided_slice %264 {offsets = [0, 64], sizes = [2, 32], strides = [1, 1]} : vector<2x96xf32> to vector<2x32xf32>
    %279 = vector.extract_strided_slice %267 {offsets = [0, 64], sizes = [2, 32], strides = [1, 1]} : vector<2x96xf32> to vector<2x32xf32>
    %280 = arith.mulf %276, %279 : vector<2x32xf32>
    %281 = arith.addf %278, %280 : vector<2x32xf32>
    %282 = math.tanh %281 : vector<2x32xf32>
    %cst_56 = arith.constant 1.000000e+00 : f32
    %283 = vector.broadcast %cst_56 : f32 to vector<2x32xf32>
    %284 = arith.subf %283, %277 : vector<2x32xf32>
    %285 = arith.mulf %284, %282 : vector<2x32xf32>
    %286 = arith.mulf %277, %237 : vector<2x32xf32>
    %287 = arith.addf %285, %286 : vector<2x32xf32>
    %cst_57 = arith.constant dense<0.000000e+00> : vector<2x96xf32>
    %288 = tpu.matmul %287, %2, %cst_57 {dimension_numbers = #tpu.dot_dimension_numbers<[1], [0], [0], [1], [0, 0, 1, 1], [], []>} : vector<2x32xf32>, vector<32x96xf32>, vector<2x96xf32> -> vector<2x96xf32>
    %289 = vector.broadcast %4 : vector<1x96xf32> to vector<2x96xf32>
    %290 = arith.addf %288, %289 : vector<2x96xf32>
    %cst_58 = arith.constant dense<0.000000e+00> : vector<2x96xf32>
    %291 = tpu.matmul %263, %1, %cst_58 {dimension_numbers = #tpu.dot_dimension_numbers<[1], [0], [0], [1], [0, 0, 1, 1], [], []>} : vector<2x32xf32>, vector<32x96xf32>, vector<2x96xf32> -> vector<2x96xf32>
    %292 = vector.broadcast %5 : vector<1x96xf32> to vector<2x96xf32>
    %293 = arith.addf %291, %292 : vector<2x96xf32>
    %294 = vector.extract_strided_slice %290 {offsets = [0, 0], sizes = [2, 64], strides = [1, 1]} : vector<2x96xf32> to vector<2x64xf32>
    %295 = vector.extract_strided_slice %293 {offsets = [0, 0], sizes = [2, 64], strides = [1, 1]} : vector<2x96xf32> to vector<2x64xf32>
    %296 = arith.addf %294, %295 : vector<2x64xf32>
    %297 = arith.negf %296 : vector<2x64xf32>
    %298 = math.exp %297 : vector<2x64xf32>
    %cst_59 = arith.constant 1.000000e+00 : f32
    %299 = vector.broadcast %cst_59 : f32 to vector<2x64xf32>
    %300 = arith.addf %299, %298 : vector<2x64xf32>
    %301 = arith.divf %299, %300 : vector<2x64xf32>
    %302 = vector.extract_strided_slice %301 {offsets = [0, 0], sizes = [2, 32], strides = [1, 1]} : vector<2x64xf32> to vector<2x32xf32>
    %303 = vector.extract_strided_slice %301 {offsets = [0, 32], sizes = [2, 32], strides = [1, 1]} : vector<2x64xf32> to vector<2x32xf32>
    %304 = vector.extract_strided_slice %290 {offsets = [0, 64], sizes = [2, 32], strides = [1, 1]} : vector<2x96xf32> to vector<2x32xf32>
    %305 = vector.extract_strided_slice %293 {offsets = [0, 64], sizes = [2, 32], strides = [1, 1]} : vector<2x96xf32> to vector<2x32xf32>
    %306 = arith.mulf %302, %305 : vector<2x32xf32>
    %307 = arith.addf %304, %306 : vector<2x32xf32>
    %308 = math.tanh %307 : vector<2x32xf32>
    %cst_60 = arith.constant 1.000000e+00 : f32
    %309 = vector.broadcast %cst_60 : f32 to vector<2x32xf32>
    %310 = arith.subf %309, %303 : vector<2x32xf32>
    %311 = arith.mulf %310, %308 : vector<2x32xf32>
    %312 = arith.mulf %303, %263 : vector<2x32xf32>
    %313 = arith.addf %311, %312 : vector<2x32xf32>
    %314 = vector.extract_strided_slice %11 {offsets = [12, 0], sizes = [2, 96], strides = [1, 1]} : vector<16x96xf32> to vector<2x96xf32>
    %cst_61 = arith.constant dense<0.000000e+00> : vector<2x96xf32>
    %315 = tpu.matmul %287, %0, %cst_61 {dimension_numbers = #tpu.dot_dimension_numbers<[1], [0], [0], [1], [0, 0, 1, 1], [], []>} : vector<2x32xf32>, vector<32x96xf32>, vector<2x96xf32> -> vector<2x96xf32>
    %316 = vector.broadcast %3 : vector<1x96xf32> to vector<2x96xf32>
    %317 = arith.addf %315, %316 : vector<2x96xf32>
    %318 = vector.extract_strided_slice %314 {offsets = [0, 0], sizes = [2, 64], strides = [1, 1]} : vector<2x96xf32> to vector<2x64xf32>
    %319 = vector.extract_strided_slice %317 {offsets = [0, 0], sizes = [2, 64], strides = [1, 1]} : vector<2x96xf32> to vector<2x64xf32>
    %320 = arith.addf %318, %319 : vector<2x64xf32>
    %321 = arith.negf %320 : vector<2x64xf32>
    %322 = math.exp %321 : vector<2x64xf32>
    %cst_62 = arith.constant 1.000000e+00 : f32
    %323 = vector.broadcast %cst_62 : f32 to vector<2x64xf32>
    %324 = arith.addf %323, %322 : vector<2x64xf32>
    %325 = arith.divf %323, %324 : vector<2x64xf32>
    %326 = vector.extract_strided_slice %325 {offsets = [0, 0], sizes = [2, 32], strides = [1, 1]} : vector<2x64xf32> to vector<2x32xf32>
    %327 = vector.extract_strided_slice %325 {offsets = [0, 32], sizes = [2, 32], strides = [1, 1]} : vector<2x64xf32> to vector<2x32xf32>
    %328 = vector.extract_strided_slice %314 {offsets = [0, 64], sizes = [2, 32], strides = [1, 1]} : vector<2x96xf32> to vector<2x32xf32>
    %329 = vector.extract_strided_slice %317 {offsets = [0, 64], sizes = [2, 32], strides = [1, 1]} : vector<2x96xf32> to vector<2x32xf32>
    %330 = arith.mulf %326, %329 : vector<2x32xf32>
    %331 = arith.addf %328, %330 : vector<2x32xf32>
    %332 = math.tanh %331 : vector<2x32xf32>
    %cst_63 = arith.constant 1.000000e+00 : f32
    %333 = vector.broadcast %cst_63 : f32 to vector<2x32xf32>
    %334 = arith.subf %333, %327 : vector<2x32xf32>
    %335 = arith.mulf %334, %332 : vector<2x32xf32>
    %336 = arith.mulf %327, %287 : vector<2x32xf32>
    %337 = arith.addf %335, %336 : vector<2x32xf32>
    %cst_64 = arith.constant dense<0.000000e+00> : vector<2x96xf32>
    %338 = tpu.matmul %337, %2, %cst_64 {dimension_numbers = #tpu.dot_dimension_numbers<[1], [0], [0], [1], [0, 0, 1, 1], [], []>} : vector<2x32xf32>, vector<32x96xf32>, vector<2x96xf32> -> vector<2x96xf32>
    %339 = vector.broadcast %4 : vector<1x96xf32> to vector<2x96xf32>
    %340 = arith.addf %338, %339 : vector<2x96xf32>
    %cst_65 = arith.constant dense<0.000000e+00> : vector<2x96xf32>
    %341 = tpu.matmul %313, %1, %cst_65 {dimension_numbers = #tpu.dot_dimension_numbers<[1], [0], [0], [1], [0, 0, 1, 1], [], []>} : vector<2x32xf32>, vector<32x96xf32>, vector<2x96xf32> -> vector<2x96xf32>
    %342 = vector.broadcast %5 : vector<1x96xf32> to vector<2x96xf32>
    %343 = arith.addf %341, %342 : vector<2x96xf32>
    %344 = vector.extract_strided_slice %340 {offsets = [0, 0], sizes = [2, 64], strides = [1, 1]} : vector<2x96xf32> to vector<2x64xf32>
    %345 = vector.extract_strided_slice %343 {offsets = [0, 0], sizes = [2, 64], strides = [1, 1]} : vector<2x96xf32> to vector<2x64xf32>
    %346 = arith.addf %344, %345 : vector<2x64xf32>
    %347 = arith.negf %346 : vector<2x64xf32>
    %348 = math.exp %347 : vector<2x64xf32>
    %cst_66 = arith.constant 1.000000e+00 : f32
    %349 = vector.broadcast %cst_66 : f32 to vector<2x64xf32>
    %350 = arith.addf %349, %348 : vector<2x64xf32>
    %351 = arith.divf %349, %350 : vector<2x64xf32>
    %352 = vector.extract_strided_slice %351 {offsets = [0, 0], sizes = [2, 32], strides = [1, 1]} : vector<2x64xf32> to vector<2x32xf32>
    %353 = vector.extract_strided_slice %351 {offsets = [0, 32], sizes = [2, 32], strides = [1, 1]} : vector<2x64xf32> to vector<2x32xf32>
    %354 = vector.extract_strided_slice %340 {offsets = [0, 64], sizes = [2, 32], strides = [1, 1]} : vector<2x96xf32> to vector<2x32xf32>
    %355 = vector.extract_strided_slice %343 {offsets = [0, 64], sizes = [2, 32], strides = [1, 1]} : vector<2x96xf32> to vector<2x32xf32>
    %356 = arith.mulf %352, %355 : vector<2x32xf32>
    %357 = arith.addf %354, %356 : vector<2x32xf32>
    %358 = math.tanh %357 : vector<2x32xf32>
    %cst_67 = arith.constant 1.000000e+00 : f32
    %359 = vector.broadcast %cst_67 : f32 to vector<2x32xf32>
    %360 = arith.subf %359, %353 : vector<2x32xf32>
    %361 = arith.mulf %360, %358 : vector<2x32xf32>
    %362 = arith.mulf %353, %313 : vector<2x32xf32>
    %363 = arith.addf %361, %362 : vector<2x32xf32>
    %364 = vector.extract_strided_slice %11 {offsets = [14, 0], sizes = [2, 96], strides = [1, 1]} : vector<16x96xf32> to vector<2x96xf32>
    %cst_68 = arith.constant dense<0.000000e+00> : vector<2x96xf32>
    %365 = tpu.matmul %337, %0, %cst_68 {dimension_numbers = #tpu.dot_dimension_numbers<[1], [0], [0], [1], [0, 0, 1, 1], [], []>} : vector<2x32xf32>, vector<32x96xf32>, vector<2x96xf32> -> vector<2x96xf32>
    %366 = vector.broadcast %3 : vector<1x96xf32> to vector<2x96xf32>
    %367 = arith.addf %365, %366 : vector<2x96xf32>
    %368 = vector.extract_strided_slice %364 {offsets = [0, 0], sizes = [2, 64], strides = [1, 1]} : vector<2x96xf32> to vector<2x64xf32>
    %369 = vector.extract_strided_slice %367 {offsets = [0, 0], sizes = [2, 64], strides = [1, 1]} : vector<2x96xf32> to vector<2x64xf32>
    %370 = arith.addf %368, %369 : vector<2x64xf32>
    %371 = arith.negf %370 : vector<2x64xf32>
    %372 = math.exp %371 : vector<2x64xf32>
    %cst_69 = arith.constant 1.000000e+00 : f32
    %373 = vector.broadcast %cst_69 : f32 to vector<2x64xf32>
    %374 = arith.addf %373, %372 : vector<2x64xf32>
    %375 = arith.divf %373, %374 : vector<2x64xf32>
    %376 = vector.extract_strided_slice %375 {offsets = [0, 0], sizes = [2, 32], strides = [1, 1]} : vector<2x64xf32> to vector<2x32xf32>
    %377 = vector.extract_strided_slice %375 {offsets = [0, 32], sizes = [2, 32], strides = [1, 1]} : vector<2x64xf32> to vector<2x32xf32>
    %378 = vector.extract_strided_slice %364 {offsets = [0, 64], sizes = [2, 32], strides = [1, 1]} : vector<2x96xf32> to vector<2x32xf32>
    %379 = vector.extract_strided_slice %367 {offsets = [0, 64], sizes = [2, 32], strides = [1, 1]} : vector<2x96xf32> to vector<2x32xf32>
    %380 = arith.mulf %376, %379 : vector<2x32xf32>
    %381 = arith.addf %378, %380 : vector<2x32xf32>
    %382 = math.tanh %381 : vector<2x32xf32>
    %cst_70 = arith.constant 1.000000e+00 : f32
    %383 = vector.broadcast %cst_70 : f32 to vector<2x32xf32>
    %384 = arith.subf %383, %377 : vector<2x32xf32>
    %385 = arith.mulf %384, %382 : vector<2x32xf32>
    %386 = arith.mulf %377, %337 : vector<2x32xf32>
    %387 = arith.addf %385, %386 : vector<2x32xf32>
    %cst_71 = arith.constant dense<0.000000e+00> : vector<2x96xf32>
    %388 = tpu.matmul %387, %2, %cst_71 {dimension_numbers = #tpu.dot_dimension_numbers<[1], [0], [0], [1], [0, 0, 1, 1], [], []>} : vector<2x32xf32>, vector<32x96xf32>, vector<2x96xf32> -> vector<2x96xf32>
    %389 = vector.broadcast %4 : vector<1x96xf32> to vector<2x96xf32>
    %390 = arith.addf %388, %389 : vector<2x96xf32>
    %cst_72 = arith.constant dense<0.000000e+00> : vector<2x96xf32>
    %391 = tpu.matmul %363, %1, %cst_72 {dimension_numbers = #tpu.dot_dimension_numbers<[1], [0], [0], [1], [0, 0, 1, 1], [], []>} : vector<2x32xf32>, vector<32x96xf32>, vector<2x96xf32> -> vector<2x96xf32>
    %392 = vector.broadcast %5 : vector<1x96xf32> to vector<2x96xf32>
    %393 = arith.addf %391, %392 : vector<2x96xf32>
    %394 = vector.extract_strided_slice %390 {offsets = [0, 0], sizes = [2, 64], strides = [1, 1]} : vector<2x96xf32> to vector<2x64xf32>
    %395 = vector.extract_strided_slice %393 {offsets = [0, 0], sizes = [2, 64], strides = [1, 1]} : vector<2x96xf32> to vector<2x64xf32>
    %396 = arith.addf %394, %395 : vector<2x64xf32>
    %397 = arith.negf %396 : vector<2x64xf32>
    %398 = math.exp %397 : vector<2x64xf32>
    %cst_73 = arith.constant 1.000000e+00 : f32
    %399 = vector.broadcast %cst_73 : f32 to vector<2x64xf32>
    %400 = arith.addf %399, %398 : vector<2x64xf32>
    %401 = arith.divf %399, %400 : vector<2x64xf32>
    %402 = vector.extract_strided_slice %401 {offsets = [0, 0], sizes = [2, 32], strides = [1, 1]} : vector<2x64xf32> to vector<2x32xf32>
    %403 = vector.extract_strided_slice %401 {offsets = [0, 32], sizes = [2, 32], strides = [1, 1]} : vector<2x64xf32> to vector<2x32xf32>
    %404 = vector.extract_strided_slice %390 {offsets = [0, 64], sizes = [2, 32], strides = [1, 1]} : vector<2x96xf32> to vector<2x32xf32>
    %405 = vector.extract_strided_slice %393 {offsets = [0, 64], sizes = [2, 32], strides = [1, 1]} : vector<2x96xf32> to vector<2x32xf32>
    %406 = arith.mulf %402, %405 : vector<2x32xf32>
    %407 = arith.addf %404, %406 : vector<2x32xf32>
    %408 = math.tanh %407 : vector<2x32xf32>
    %cst_74 = arith.constant 1.000000e+00 : f32
    %409 = vector.broadcast %cst_74 : f32 to vector<2x32xf32>
    %410 = arith.subf %409, %403 : vector<2x32xf32>
    %411 = arith.mulf %410, %408 : vector<2x32xf32>
    %412 = arith.mulf %403, %363 : vector<2x32xf32>
    %413 = arith.addf %411, %412 : vector<2x32xf32>
    %cst_75 = arith.constant dense<0.000000e+00> : vector<2xf32>
    %414 = vector.multi_reduction <add>, %413, %cst_75 [1] : vector<2x32xf32> to vector<2xf32>
    %415 = vector.shape_cast %414 : vector<2xf32> to vector<2x1xf32>
    %cst_76 = arith.constant 3.200000e+01 : f32
    %416 = vector.broadcast %cst_76 : f32 to vector<2x1xf32>
    %417 = arith.divf %415, %416 : vector<2x1xf32>
    %418 = vector.broadcast %417 : vector<2x1xf32> to vector<2x32xf32>
    %419 = arith.subf %413, %418 : vector<2x32xf32>
    %420 = arith.mulf %419, %419 : vector<2x32xf32>
    %cst_77 = arith.constant dense<0.000000e+00> : vector<2xf32>
    %421 = vector.multi_reduction <add>, %420, %cst_77 [1] : vector<2x32xf32> to vector<2xf32>
    %422 = vector.shape_cast %421 : vector<2xf32> to vector<2x1xf32>
    %cst_78 = arith.constant 3.200000e+01 : f32
    %423 = vector.broadcast %cst_78 : f32 to vector<2x1xf32>
    %424 = arith.divf %422, %423 : vector<2x1xf32>
    %425 = vector.broadcast %417 : vector<2x1xf32> to vector<2x32xf32>
    %426 = arith.subf %413, %425 : vector<2x32xf32>
    %cst_79 = arith.constant 9.99999974E-6 : f32
    %427 = vector.broadcast %cst_79 : f32 to vector<2x1xf32>
    %428 = arith.addf %424, %427 : vector<2x1xf32>
    %429 = math.rsqrt %428 : vector<2x1xf32>
    %430 = vector.broadcast %429 : vector<2x1xf32> to vector<2x32xf32>
    %431 = arith.mulf %426, %430 : vector<2x32xf32>
    %c0_80 = arith.constant 0 : index
    %c0_81 = arith.constant 0 : index
    %432 = vector.load %arg9[%c0_80, %c0_81] : memref<1x32xf32, #tpu.memory_space<vmem>>, vector<1x32xf32>
    %433 = vector.broadcast %432 : vector<1x32xf32> to vector<2x32xf32>
    %434 = arith.mulf %431, %433 : vector<2x32xf32>
    %c0_82 = arith.constant 0 : index
    %c0_83 = arith.constant 0 : index
    %435 = vector.load %arg10[%c0_82, %c0_83] : memref<1x32xf32, #tpu.memory_space<vmem>>, vector<1x32xf32>
    %436 = vector.broadcast %435 : vector<1x32xf32> to vector<2x32xf32>
    %437 = arith.addf %434, %436 : vector<2x32xf32>
    %c0_84 = arith.constant 0 : index
    %438 = memref.load %arg14[%c0_84] : memref<6xf32, #tpu.memory_space<smem>>
    %c1 = arith.constant 1 : index
    %439 = memref.load %arg14[%c1] : memref<6xf32, #tpu.memory_space<smem>>
    %c2 = arith.constant 2 : index
    %440 = memref.load %arg14[%c2] : memref<6xf32, #tpu.memory_space<smem>>
    %c3 = arith.constant 3 : index
    %441 = memref.load %arg14[%c3] : memref<6xf32, #tpu.memory_space<smem>>
    %c4 = arith.constant 4 : index
    %442 = memref.load %arg14[%c4] : memref<6xf32, #tpu.memory_space<smem>>
    %c5 = arith.constant 5 : index
    %443 = memref.load %arg14[%c5] : memref<6xf32, #tpu.memory_space<smem>>
    %c0_85 = arith.constant 0 : index
    %c0_86 = arith.constant 0 : index
    %444 = vector.load %arg11[%c0_85, %c0_86] : memref<32x16xf32, #tpu.memory_space<vmem>>, vector<32x16xf32>
    %c0_87 = arith.constant 0 : index
    %c0_88 = arith.constant 0 : index
    %445 = vector.load %arg12[%c0_87, %c0_88] : memref<1x16xf32, #tpu.memory_space<vmem>>, vector<1x16xf32>
    %c0_89 = arith.constant 0 : index
    %c0_90 = arith.constant 0 : index
    %446 = vector.load %arg13[%c0_89, %c0_90] : memref<1x16xf32, #tpu.memory_space<vmem>>, vector<1x16xf32>
    %447 = arith.mulf %437, %437 : vector<2x32xf32>
    %cst_91 = arith.constant dense<0.000000e+00> : vector<2xf32>
    %448 = vector.multi_reduction <add>, %447, %cst_91 [1] : vector<2x32xf32> to vector<2xf32>
    %449 = vector.shape_cast %448 : vector<2xf32> to vector<2x1xf32>
    %450 = vector.broadcast %449 : vector<2x1xf32> to vector<2x16xf32>
    %451 = vector.broadcast %445 : vector<1x16xf32> to vector<2x16xf32>
    %452 = arith.addf %450, %451 : vector<2x16xf32>
    %cst_92 = arith.constant dense<0.000000e+00> : vector<2x16xf32>
    %453 = tpu.matmul %437, %444, %cst_92 {dimension_numbers = #tpu.dot_dimension_numbers<[1], [0], [0], [1], [0, 0, 1, 1], [], []>} : vector<2x32xf32>, vector<32x16xf32>, vector<2x16xf32> -> vector<2x16xf32>
    %cst_93 = arith.constant 2.000000e+00 : f32
    %454 = vector.broadcast %cst_93 : f32 to vector<2x16xf32>
    %455 = arith.mulf %454, %453 : vector<2x16xf32>
    %456 = arith.subf %452, %455 : vector<2x16xf32>
    %cst_94 = arith.constant 0.000000e+00 : f32
    %457 = vector.broadcast %cst_94 : f32 to vector<2x16xf32>
    %458 = arith.maximumf %456, %457 : vector<2x16xf32>
    %459 = vector.broadcast %439 : f32 to vector<2x16xf32>
    %460 = arith.mulf %458, %459 : vector<2x16xf32>
    %461 = math.sqrt %460 : vector<2x16xf32>
    %cst_95 = arith.constant 5.000000e+00 : f32
    %462 = math.sqrt %cst_95 : f32
    %463 = vector.broadcast %462 : f32 to vector<2x16xf32>
    %464 = arith.mulf %463, %461 : vector<2x16xf32>
    %cst_96 = arith.constant 1.000000e+00 : f32
    %465 = vector.broadcast %cst_96 : f32 to vector<2x16xf32>
    %466 = arith.addf %465, %464 : vector<2x16xf32>
    %cst_97 = arith.constant 1.66666663 : f32
    %467 = vector.broadcast %cst_97 : f32 to vector<2x16xf32>
    %468 = arith.mulf %467, %460 : vector<2x16xf32>
    %469 = arith.addf %466, %468 : vector<2x16xf32>
    %cst_98 = arith.constant 0.000000e+00 : f32
    %470 = arith.subf %cst_98, %462 : f32
    %471 = vector.broadcast %470 : f32 to vector<2x16xf32>
    %472 = arith.mulf %471, %461 : vector<2x16xf32>
    %473 = math.exp %472 : vector<2x16xf32>
    %474 = arith.mulf %469, %473 : vector<2x16xf32>
    %cst_99 = arith.constant -5.000000e-01 : f32
    %475 = vector.broadcast %cst_99 : f32 to vector<2x16xf32>
    %476 = arith.mulf %475, %458 : vector<2x16xf32>
    %477 = vector.broadcast %440 : f32 to vector<2x16xf32>
    %478 = arith.mulf %476, %477 : vector<2x16xf32>
    %479 = math.exp %478 : vector<2x16xf32>
    %480 = arith.addf %474, %479 : vector<2x16xf32>
    %481 = vector.broadcast %438 : f32 to vector<2x16xf32>
    %482 = arith.mulf %481, %480 : vector<2x16xf32>
    %483 = vector.broadcast %446 : vector<1x16xf32> to vector<2x16xf32>
    %484 = arith.mulf %482, %483 : vector<2x16xf32>
    %cst_100 = arith.constant dense<0.000000e+00> : vector<2xf32>
    %485 = vector.multi_reduction <add>, %484, %cst_100 [1] : vector<2x16xf32> to vector<2xf32>
    %486 = vector.shape_cast %485 : vector<2xf32> to vector<2x1xf32>
    %487 = vector.broadcast %441 : f32 to vector<2x1xf32>
    %488 = arith.addf %486, %487 : vector<2x1xf32>
    %489 = vector.broadcast %442 : f32 to vector<2x1xf32>
    %490 = arith.mulf %488, %489 : vector<2x1xf32>
    %491 = vector.broadcast %443 : f32 to vector<2x1xf32>
    %492 = arith.addf %490, %491 : vector<2x1xf32>
    %c0_101 = arith.constant 0 : index
    %c0_102 = arith.constant 0 : index
    %493 = vector.load %arg15[%c0_101, %c0_102] : memref<2x1xf32, #tpu.memory_space<vmem>>, vector<2x1xf32>
    tpu.vector_store %arg15[%c0_101, %c0_102], %492 {strides = array<i32>} : memref<2x1xf32, #tpu.memory_space<vmem>>, vector<2x1xf32>,
    return
  }
}

</mosaic_0001>

<bundles_post_ra>
// kernel: residual_model_forward.1
= control target key start
LH: loop header
LB: loop body
LE: loop exit
PB: predicated region body
PF: predicated region fallthrough
CT: control target
= control target key end

     0   :  { %20 = vsyncpa [#allocation3], 0  ;;  %s3919_s0 = inlined_call_operand.vmem [shape: f32[16,8], index: 0, kind: input, shape index: {}]   ;;  %s3920_s1 = inlined_call_operand.vmem [shape: f32[8,96], index: 1, kind: input, shape index: {}]   ;;  %s3921_s2 = inlined_call_operand.vmem [shape: f32[32,96], index: 2, kind: input, shape index: {}]   ;;  %s3922_s3 = inlined_call_operand.vmem [shape: f32[1,96], index: 3, kind: input, shape index: {}]   ;;  %s3923_s4 = inlined_call_operand.vmem [shape: f32[1,96], index: 4, kind: input, shape index: {}]   ;;  %s3924_s5 = inlined_call_operand.vmem [shape: f32[32,96], index: 5, kind: input, shape index: {}]   ;;  %s3925_s6 = inlined_call_operand.vmem [shape: f32[32,96], index: 6, kind: input, shape index: {}]   ;;  %s3926_s7 = inlined_call_operand.vmem [shape: f32[1,96], index: 7, kind: input, shape index: {}]   ;;  %s3927_s8 = inlined_call_operand.vmem [shape: f32[1,96], index: 8, kind: input, shape index: {}]   ;;  %s3928_s9 = inlined_call_operand.vmem [shape: f32[1,32], index: 9, kind: input, shape index: {}]   ;;  %s3929_s10 = inlined_call_operand.vmem [shape: f32[1,32], index: 10, kind: input, shape index: {}]   ;;  %s3930_s11 = inlined_call_operand.vmem [shape: f32[32,16], index: 11, kind: input, shape index: {}]   ;;  %s3931_s12 = inlined_call_operand.vmem [shape: f32[1,16], index: 12, kind: input, shape index: {}]   ;;  %s3932_s13 = inlined_call_operand.hbm [shape: f32[1,16], index: 13, kind: input, shape index: {}]   ;;  %s3933_s14 = inlined_call_operand.vmem [shape: f32[6], index: 14, kind: input, shape index: {}]   ;;  %s3934_s15 = inlined_call_operand.vmem [shape: f32[2,1], index: 15, kind: output, shape index: {}]  }
   0x1   :  { %21 = vsyncpa [#allocation4], 0  ;;  %s64_s20 = sshll.u32 %s3933_s14, 4  ;;  %s3369_s21 = smov [#allocation2]   ;;  %s65_s20 = int_to_ptr.vmem [resolvable:$true] %s64_s20 }
   0x2   :  { %s54_s22 = sshll.u32 %s3369_s21, 4  ;;  %s3331_s25 = scalar_lea.hbm %s3932_s13, 16  ;;  %s55_s22 = int_to_ptr.vmem [resolvable:$true] %s54_s22 }
   0x3   :  { %p3332_p0 = scmp.ne.s32.totalorder %s3932_s13, %s3331_s25  ;;  %p3335_p1 = scmp.lt.u32.totalorder %s3331_s25, %s3932_s13 }
   0x5   :  { %p3337_p2 = pnand %p3335_p1, %p3332_p0 }
   0x7   :  { %3340 = shalt.err (!%p3337_p2)
}
   0x8   :  { %s3341_s30 = scalar_lea.vmem %s55_s22, 16  ;;  %s3345_s14 = scalar_lea.vmem %s55_s22, 32 }
   0x9   :  { %p3342_p3 = scmp.ne.s32.totalorder %s55_s22, %s3341_s30  ;;  %p3346_p4 = scmp.lt.s32.totalorder %s55_s22, %s55_s22 }
   0xa   :  { %p3347_p5 = scmp.lt.s32.totalorder %s3345_s14, %s3341_s30 }
   0xc   :  { %p3348_p6 = por %p3347_p5, %p3346_p4 }
   0xe   :  { %p3349_p7 = pnand %p3348_p6, %p3342_p3 }
  0x10   :  { %3352 = shalt.err (!%p3349_p7)
}
  0x11   :  { %57 = dma.hbm_to_vmem [thread:$0]  %s3932_s13, 16, %s55_s22, [#allocation3]  }
  0x12   :  { %s3353_s18 = scalar_lea.vmem %s65_s20, 16  ;;  %p3358_p9 = scmp.lt.s32.totalorder %s65_s20, %s65_s20 }
  0x13   :  { %p3354_p8 = scmp.ne.s32.totalorder %s65_s20, %s3353_s18  ;;  %p3359_p10 = scmp.lt.s32.totalorder %s3353_s18, %s3353_s18 }
  0x15   :  { %p3360_p11 = por %p3359_p10, %p3358_p9 }
  0x17   :  { %p3361_p12 = pnand %p3360_p11, %p3354_p8 }
  0x19   :  { %3364 = shalt.err (!%p3361_p12)
}
  0x1a   :  { %s3370_s19 = smov [#allocation5]  }
  0x1b   :  { %67 = dma.vmem_to_smem %s65_s20, 16, %s3370_s19, [#allocation4]  }
  0x1c   :  { %3365 = dma.done.wait [#allocation3], 16  }
  0x1d   :  { %3366 = vsyncadd [#allocation3], 4294967280 }
  0x1e   :  { %3367 = dma.done.wait [#allocation4], 16  }
  0x1f   :  { %3368 = vsyncadd [#allocation4], 4294967280 }
  0x20   :  { %74 = sfence }
  0x21   :  { %v75_v0 = vld [vmem:[%s3921_s2] sm:$0xff]  ;;  %v76_v1 = vld [vmem:[%s3921_s2 + $0x8] sm:$0xff]  ;;  %vm100_vm0 = vcmask 64512   ;;  %v3371_v3 = vmov 0.0|0.0   ;;  %v77_v5 = vld [vmem:[%s3921_s2 + $0x10] sm:$0xff]  ;;  %vm3372_vm1 = vmmov 0  }
  0x22   :  { %v92_v2 = vld [vmem:[%s3920_s1] sm:$0xff]  ;;  %3066 = vmatprep.subr.bf16.mxu1 %v3371_v3  ;;  %v3482_v4 = vpack.c.bf16 %v76_v1, %v75_v0  ;;  %v78_v6 = vld [vmem:[%s3921_s2 + $0x18] sm:$0xff]  ;;  %v91_v8 = vld [vmem:[%s3919_s0 + $0x8] sm:$0xff]  ;;  %v3373_v10 = vmov 0.0   ;;  %s3374_s18 = smov 64   ;;  %vm188_vm2 = vcmask 261120  }
  0x23   :  { %2786 = vmatprep.subr.mxu0 %v92_v2  ;;  %v90_v7 = vld [vmem:[%s3919_s0] sm:$0xff]  ;;  %v3497_v9 = vpack.c.bf16 %v78_v6, %v77_v5  ;;  %2799 = vmatprep.mubr.msk.f32.mxu1 %vm3372_vm1, %v3373_v10  ;;  %v80_v30 = vld [vmem:[%s3925_s6 + $0x8] sm:$0xff]  ;;  %v81_v31 = vld [vmem:[%s3925_s6 + $0x10] sm:$0xff]  ;;  %vm2410_vm3 = vcmask 254976   ;;  %s2651_s1 = sld [smem:[#allocation5 + $0x2]]  ;;  %vm2586_vm6 = vcmask 123904  }
  0x24   :  { %2787 = vmatpush3.msra.mxu0 %v92_v2  ;;  %2788 = vmatprep.mubr.msk.f32.mxu0 %vm100_vm0, %v90_v7  ;;  %v2604_v12 = vld [vmem:[%s3922_s3] ss:$0 sm:$0xff]  ;;  %v82_v33 = vld [vmem:[%s3925_s6 + $0x18] sm:$0xff]  ;;  %v84_v35 = vld [vmem:[%s3924_s5 + $0x8] sm:$0xff]  ;;  %s2652_s14 = sld [smem:[#allocation5 + $0x3]]  ;;  %vm2596_vm7 = vcmask 1024  }
  0x25   :  { %3068 = vmatpush3.bf16.msra.mxu1 %v3482_v4  ;;  %2789 = vmatmul.mubr.msk.f32.vlgmr.msra.gmra.mrb[0].mxu0 %vm100_vm0, %v91_v8  ;;  %v3518_v15 = vld [vmem:[%s3923_s4] ss:$0 sm:$0xff]  ;;  %v85_v37 = vld [vmem:[%s3924_s5 + $0x10] sm:$0xff]  ;;  %v86_v38 = vld [vmem:[%s3924_s5 + $0x18] sm:$0xff]  ;;  %v3556_v39 = vpack.c.bf16 %v82_v33, %v81_v31 }
  0x26   :  { %3069 = vmatprep.subr.bf16.mxu1 %v3371_v3  ;;  %3072 = vmatprep.subr.bf16.mxu0 %v3371_v3  ;;  %v79_v29 = vld [vmem:[%s3925_s6] sm:$0xff]  ;;  %v3560_v40 = vpack.c.bf16 %v86_v38, %v85_v37  ;;  %s2654_s6 = sld [smem:[#allocation5 + $0x5]] }
  0x27   :  { %2810 = vmatprep.mubr.msk.f32.mxu0 %vm3372_vm1, %v3373_v10  ;;  %v3536_v32 = vpack.c.bf16 %v80_v30, %v79_v29  ;;  %v83_v34 = vld [vmem:[%s3924_s5] sm:$0xff]  ;;  %s3375_s5 = smov 96  }
  0x28   :  { %v3547_v36 = vpack.c.bf16 %v84_v35, %v83_v34  ;;  %v3582_v47 = vld [vmem:[%s3927_s8] ss:$0 sm:$0xff] }
  0x29   :  { %3071 = vmatpush3.bf16.msra.mxu1 %v3497_v9  ;;  %v3603_v52 = vld [vmem:[%s3926_s7] ss:$0 sm:$0xff] }
  0x2a   :  { %3078 = vmatprep.subr.bf16.mxu1 %v3371_v3  ;;  %3074 = vmatpush3.bf16.msra.mxu0 %v3547_v36 }
  0x2b   :  { %3075 = vmatprep.subr.bf16.mxu0 %v3371_v3 }
  0x2c   :  { %2800 = vmatmul.mubr.f32.vlgmr.msra.gmra.mrb[0].mxu1 %v3373_v10 }
  0x2d   :  { %2821 = vmatprep.mubr.msk.f32.mxu1 %vm3372_vm1, %v3373_v10  ;;  %3080 = vmatpush3.bf16.msra.mxu1 %v3536_v32 }
  0x2e   :  { %3081 = vmatprep.subr.bf16.mxu1 %v3371_v3  ;;  %3077 = vmatpush3.bf16.msra.mxu0 %v3560_v40 }
  0x2f   :  { %3084 = vmatprep.subr.bf16.mxu0 %v3371_v3 }
  0x31   :  { %3083 = vmatpush3.bf16.msra.mxu1 %v3556_v39 }
  0x32   :  { %3090 = vmatprep.subr.bf16.mxu1 %v3371_v3 }
  0x34   :  { %2822 = vmatmul.mubr.f32.vlgmr.msra.gmra.mrb[2].mxu1 %v3373_v10 }
  0x35   :  { %3092 = vmatpush3.bf16.msra.mxu1 %v3547_v36  ;;  %2843 = vmatprep.mubr.msk.f32.mxu1 %vm3372_vm1, %v3373_v10 }
  0x36   :  { %3093 = vmatprep.subr.bf16.mxu1 %v3371_v3 }
  0x39   :  { %3095 = vmatpush3.bf16.msra.mxu1 %v3560_v40 }
  0x3a   :  { %3102 = vmatprep.subr.bf16.mxu1 %v3371_v3 }
  0xf8   :  { %v2790_v11 = vpop.f32.mrb[0].mxu0 }
  0xf9   :  { %v3513_v13 = vadd.f32 %v2790_v11, %v2604_v12  ;;  %v173_v14 = vpop.f32.mrb[1].mxu0 }
  0xfa   :  { %v3522_v19 = vadd.f32 %v2604_v12, %v173_v14 }
  0xff   :  { %v258_v16 = vpop.f32.mrb[0].mxu1 }
 0x100   :  { %v259_v17 = vadd.f32 %v3518_v15, %v258_v16  ;;  %v2801_v18 = vpop.f32.mrb[1].mxu1 }
 0x102   :  { %270 = vrot.lane.b32.xlu0 %v259_v17, %s3374_s18  ;;  %v262_v20 = vadd.f32 %v259_v17, %v3522_v19 }
 0x104   :  { %v2608_v21 = vmul.f32 -1.442695, %v262_v20 }
 0x106   :  { %3224 = vpow2.f32 %v2608_v21 }
 0x107   :  { %v441_v48 = vpop.f32.mrb[2].mxu1 }
 0x108   :  { %v442_v49 = vadd.f32 %v3582_v47, %v441_v48  ;;  %v2823_v50 = vpop.f32.mrb[3].mxu1 }
 0x110   :  { %v3225_v22 = vpop.eup %3224 }
 0x111   :  { %v266_v23 = vadd.f32 1.0, %v3225_v22 }
 0x113   :  { %3226 = vrcp.f32 %v266_v23 }
 0x11d   :  { %v3227_v24 = vpop.eup %3226 }
 0x11e   :  { %v280_v42 = vsub.f32 1.0, %v3227_v24  ;;  %v286_v44 = vmul.f32 0.0, %v3227_v24 }
 0x174   :  { %v271_v25 = vpop.permute.xlu0 %270 }
 0x175   :  { %v273_v26 = vmul.f32 %v3227_v24, %v271_v25 }
 0x177   :  { %275 = vrot.lane.b32.xlu0 %v273_v26, %s3374_s18 }
 0x1e9   :  { %v276_v27 = vpop.permute.xlu0 %275 }
 0x1ea   :  { %v278_v28 = vadd.f32 %v276_v27, %v3522_v19 }
 0x1ec   :  { %3228 = vtanh.f32 %v278_v28 }
 0x1f6   :  { %v3229_v41 = vpop.eup %3228 }
 0x1f7   :  { %282 = vrot.lane.b32.xlu1 %v3229_v41, %s3375_s5 }
 0x269   :  { %v283_v43 = vpop.permute.xlu1 %282 }
 0x26a   :  { %v285_v45 = vmul.f32 %v283_v43, %v280_v42 }
 0x26c   :  { %v3575_v46 = vadd.f32 %v286_v44, %v285_v45 }
 0x26e   :  { %295 = vrot.lane.b32.xlu1 %v3575_v46, %s3375_s5  ;;  %v567_v28 = vrot.slane %v3575_v46, 6 }
 0x272   :  { %453 = vrot.lane.b32.xlu1 %v442_v49, %s3374_s18 }
 0x2e0   :  { %v296_v51 = vpop.permute.xlu1 %295 }
 0x2e1   :  { %2811 = vmatmul.mubr.msk.f32.vlgmr.msra.gmra.mrb[2].mxu0 %vm188_vm2, %v296_v51 }
 0x2e2   :  { %3086 = vmatpush3.bf16.msra.mxu0 %v3482_v4  ;;  %2832 = vmatprep.mubr.msk.f32.mxu0 %vm3372_vm1, %v3373_v10 }
 0x2e3   :  { %3087 = vmatprep.subr.bf16.mxu0 %v3371_v3 }
 0x2e4   :  { %v454_v0 = vpop.permute.xlu1 %453 }
 0x2e6   :  { %3089 = vmatpush3.bf16.msra.mxu0 %v3497_v9 }
 0x2e7   :  { %3096 = vmatprep.subr.bf16.mxu0 %v3371_v3 }
 0x2e9   :  { %2833 = vmatmul.mubr.msk.f32.vlgmr.msra.gmra.mrb[4].mxu0 %vm188_vm2, %v296_v51 }
 0x2ea   :  { %3098 = vmatpush3.bf16.msra.mxu0 %v3536_v32  ;;  %2854 = vmatprep.mubr.msk.f32.mxu0 %vm3372_vm1, %v3373_v10 }
 0x2eb   :  { %3099 = vmatprep.subr.bf16.mxu0 %v3371_v3 }
 0x2ee   :  { %3101 = vmatpush3.bf16.msra.mxu0 %v3556_v39 }
 0x2ef   :  { %3108 = vmatprep.subr.bf16.mxu0 %v3371_v3 }
 0x3b4   :  { %v365_v53 = vpop.f32.mrb[2].mxu0 }
 0x3b5   :  { %v366_v54 = vadd.f32 %v3603_v52, %v365_v53  ;;  %v2812_v55 = vpop.f32.mrb[3].mxu0 }
 0x3b7   :  { %v445_v56 = vadd.f32 %v442_v49, %v366_v54 }
 0x3b9   :  { %v2612_v57 = vmul.f32 -1.442695, %v445_v56 }
 0x3bb   :  { %3230 = vpow2.f32 %v2612_v57 }
 0x3bc   :  { %v537_v58 = vpop.f32.mrb[4].mxu0 }
 0x3bd   :  { %v538_v59 = vadd.f32 %v3518_v15, %v537_v58  ;;  %v2834_v60 = vpop.f32.mrb[5].mxu0 }
 0x3bf   :  { %v542_v61 = vrot.slane %v538_v59, 6 }
 0x3c1   :  { %551 = vrot.lane.b32.xlu0 %v542_v61, %s3374_s18  ;;  %v544_v5 = vadd.f32 %v542_v61, %v3522_v19 }
 0x3c3   :  { %v2614_v6 = vmul.f32 -1.442695, %v544_v5 }
 0x3c5   :  { %v3231_v62 = vpop.eup %3230 }
 0x3c6   :  { %v449_v63 = vadd.f32 1.0, %v3231_v62 }
 0x3c8   :  { %3232 = vrcp.f32 %v449_v63 }
 0x3c9   :  { %3234 = vpow2.f32 %v2614_v6 }
 0x3d2   :  { %v3233_v1 = vpop.eup %3232 }
 0x3d3   :  { %v456_v2 = vmul.f32 %v3233_v1, %v454_v0  ;;  %v3235_v7 = vpop.eup %3234  ;;  %v463_v23 = vsub.f32 1.0, %v3233_v1  ;;  %v469_v25 = vmul.f32 0.0, %v3233_v1 }
 0x3d4   :  { %v548_v8 = vadd.f32 1.0, %v3235_v7 }
 0x3d5   :  { %458 = vrot.lane.b32.xlu1 %v456_v2, %s3374_s18 }
 0x3d6   :  { %3236 = vrcp.f32 %v548_v8 }
 0x3e0   :  { %v3237_v11 = vpop.eup %3236 }
 0x3e1   :  { %v561_v29 = vsub.f32 1.0, %v3237_v11  ;;  %v569_v33 = vmul.f32 %v3237_v11, %v567_v28 }
 0x433   :  { %v552_v12 = vpop.permute.xlu0 %551 }
 0x434   :  { %v554_v14 = vmul.f32 %v3237_v11, %v552_v12 }
 0x436   :  { %556 = vrot.lane.b32.xlu0 %v554_v14, %s3374_s18 }
 0x447   :  { %v459_v16 = vpop.permute.xlu1 %458 }
 0x448   :  { %v461_v17 = vadd.f32 %v459_v16, %v366_v54 }
 0x44a   :  { %3238 = vtanh.f32 %v461_v17 }
 0x454   :  { %v3239_v18 = vpop.eup %3238 }
 0x455   :  { %465 = vrot.lane.b32.xlu1 %v3239_v18, %s3375_s5 }
 0x4a8   :  { %v557_v20 = vpop.permute.xlu0 %556 }
 0x4a9   :  { %v559_v21 = vadd.f32 %v557_v20, %v3522_v19 }
 0x4ab   :  { %3240 = vtanh.f32 %v559_v21 }
 0x4b5   :  { %v3241_v22 = vpop.eup %3240 }
 0x4b6   :  { %563 = vrot.lane.b32.xlu0 %v3241_v22, %s3375_s5 }
 0x4c7   :  { %v466_v24 = vpop.permute.xlu1 %465 }
 0x4c8   :  { %v468_v26 = vmul.f32 %v466_v24, %v463_v23 }
 0x4ca   :  { %v3614_v27 = vadd.f32 %v469_v25, %v468_v26 }
 0x4cc   :  { %648 = vrot.lane.b32.xlu1 %v3614_v27, %s3375_s5 }
 0x528   :  { %v564_v30 = vpop.permute.xlu0 %563 }
 0x529   :  { %v566_v31 = vmul.f32 %v564_v30, %v561_v29 }
 0x52b   :  { %v3619_v34 = vadd.f32 %v569_v33, %v566_v31 }
 0x52d   :  { %v572_v35 = vrot.slane %v3619_v34, 2  ;;  %v844_v21 = vrot.slane %v3619_v34, 6 }
 0x52f   :  { %573 = vrot.lane.b32.xlu0 %v572_v35, %s3375_s5 }
 0x53e   :  { %v649_v37 = vpop.permute.xlu1 %648 }
 0x53f   :  { %2855 = vmatmul.mubr.msk.f32.vlgmr.msra.gmra.mrb[6].mxu0 %vm188_vm2, %v649_v37 }
 0x540   :  { %3110 = vmatpush3.bf16.msra.mxu0 %v3547_v36  ;;  %2876 = vmatprep.mubr.msk.f32.mxu0 %vm3372_vm1, %v3373_v10 }
 0x541   :  { %3111 = vmatprep.subr.bf16.mxu0 %v3371_v3 }
 0x544   :  { %3113 = vmatpush3.bf16.msra.mxu0 %v3560_v40 }
 0x545   :  { %3120 = vmatprep.subr.bf16.mxu0 %v3371_v3 }
 0x5a1   :  { %v574_v38 = vpop.permute.xlu0 %573 }
 0x5a2   :  { %2844 = vmatmul.mubr.msk.f32.vlgmr.msra.gmra.mrb[4].mxu1 %vm188_vm2, %v574_v38 }
 0x5a3   :  { %3104 = vmatpush3.bf16.msra.mxu1 %v3482_v4  ;;  %2865 = vmatprep.mubr.msk.f32.mxu1 %vm3372_vm1, %v3373_v10 }
 0x5a4   :  { %3105 = vmatprep.subr.bf16.mxu1 %v3371_v3 }
 0x5a7   :  { %3107 = vmatpush3.bf16.msra.mxu1 %v3497_v9 }
 0x5a8   :  { %3114 = vmatprep.subr.bf16.mxu1 %v3371_v3 }
 0x5aa   :  { %2866 = vmatmul.mubr.msk.f32.vlgmr.msra.gmra.mrb[6].mxu1 %vm188_vm2, %v574_v38 }
 0x5ab   :  { %3116 = vmatpush3.bf16.msra.mxu1 %v3536_v32  ;;  %2887 = vmatprep.mubr.msk.f32.mxu1 %vm3372_vm1, %v3373_v10 }
 0x5ac   :  { %3117 = vmatprep.subr.bf16.mxu1 %v3371_v3 }
 0x5af   :  { %3119 = vmatpush3.bf16.msra.mxu1 %v3556_v39 }
 0x5b0   :  { %3126 = vmatprep.subr.bf16.mxu1 %v3371_v3 }
 0x612   :  { %v718_v41 = vpop.f32.mrb[6].mxu0 }
 0x613   :  { %v719_v42 = vadd.f32 %v3582_v47, %v718_v41  ;;  %v2856_v43 = vpop.f32.mrb[7].mxu0 }
 0x615   :  { %730 = vrot.lane.b32.xlu1 %v719_v42, %s3374_s18 }
 0x675   :  { %v643_v44 = vpop.f32.mrb[4].mxu1 }
 0x676   :  { %v644_v45 = vadd.f32 %v3603_v52, %v643_v44  ;;  %v2845_v46 = vpop.f32.mrb[5].mxu1 }
 0x678   :  { %v722_v48 = vadd.f32 %v719_v42, %v644_v45 }
 0x67a   :  { %v2617_v49 = vmul.f32 -1.442695, %v722_v48 }
 0x67c   :  { %3242 = vpow2.f32 %v2617_v49 }
 0x67d   :  { %v814_v50 = vpop.f32.mrb[6].mxu1 }
 0x67e   :  { %v815_v51 = vadd.f32 %v3518_v15, %v814_v50  ;;  %v2867_v53 = vpop.f32.mrb[7].mxu1 }
 0x680   :  { %v819_v54 = vrot.slane %v815_v51, 4 }
 0x682   :  { %828 = vrot.lane.b32.xlu0 %v819_v54, %s3374_s18  ;;  %v821_v60 = vadd.f32 %v819_v54, %v3522_v19 }
 0x684   :  { %v2619_v61 = vmul.f32 -1.442695, %v821_v60 }
 0x686   :  { %v3243_v55 = vpop.eup %3242 }
 0x687   :  { %v726_v56 = vadd.f32 1.0, %v3243_v55  ;;  %v731_v58 = vpop.permute.xlu1 %730 }
 0x689   :  { %3244 = vrcp.f32 %v726_v56 }
 0x68a   :  { %3246 = vpow2.f32 %v2619_v61 }
 0x693   :  { %v3245_v57 = vpop.eup %3244 }
 0x694   :  { %v733_v59 = vmul.f32 %v3245_v57, %v731_v58  ;;  %v3247_v62 = vpop.eup %3246  ;;  %v740_v14 = vsub.f32 1.0, %v3245_v57  ;;  %v746_v17 = vmul.f32 %v3245_v57, %v3614_v27 }
 0x695   :  { %v825_v63 = vadd.f32 1.0, %v3247_v62 }
 0x696   :  { %735 = vrot.lane.b32.xlu1 %v733_v59, %s3374_s18 }
 0x697   :  { %3248 = vrcp.f32 %v825_v63 }
 0x6a1   :  { %v3249_v0 = vpop.eup %3248 }
 0x6a2   :  { %v838_v22 = vsub.f32 1.0, %v3249_v0  ;;  %v846_v24 = vmul.f32 %v3249_v0, %v844_v21 }
 0x6f4   :  { %v829_v1 = vpop.permute.xlu0 %828 }
 0x6f5   :  { %v831_v2 = vmul.f32 %v3249_v0, %v829_v1 }
 0x6f7   :  { %833 = vrot.lane.b32.xlu0 %v831_v2, %s3374_s18 }
 0x708   :  { %v736_v5 = vpop.permute.xlu1 %735 }
 0x709   :  { %v738_v6 = vadd.f32 %v736_v5, %v644_v45 }
 0x70b   :  { %3250 = vtanh.f32 %v738_v6 }
 0x715   :  { %v3251_v7 = vpop.eup %3250 }
 0x716   :  { %742 = vrot.lane.b32.xlu1 %v3251_v7, %s3375_s5 }
 0x769   :  { %v834_v8 = vpop.permute.xlu0 %833 }
 0x76a   :  { %v836_v11 = vadd.f32 %v834_v8, %v3522_v19 }
 0x76c   :  { %3252 = vtanh.f32 %v836_v11 }
 0x776   :  { %v3253_v12 = vpop.eup %3252 }
 0x777   :  { %840 = vrot.lane.b32.xlu0 %v3253_v12, %s3375_s5 }
 0x788   :  { %v743_v16 = vpop.permute.xlu1 %742 }
 0x789   :  { %v745_v18 = vmul.f32 %v743_v16, %v740_v14 }
 0x78b   :  { %v3656_v20 = vadd.f32 %v746_v17, %v745_v18 }
 0x78d   :  { %925 = vrot.lane.b32.xlu1 %v3656_v20, %s3375_s5 }
 0x7e9   :  { %v841_v23 = vpop.permute.xlu0 %840 }
 0x7ea   :  { %v843_v25 = vmul.f32 %v841_v23, %v838_v22 }
 0x7ec   :  { %v3661_v26 = vadd.f32 %v846_v24, %v843_v25 }
 0x7ee   :  { %v849_v28 = vrot.slane %v3661_v26, 4  ;;  %v1121_v11 = vrot.slane %v3661_v26, 6 }
 0x7f0   :  { %850 = vrot.lane.b32.xlu0 %v849_v28, %s3375_s5 }
 0x7ff   :  { %v926_v29 = vpop.permute.xlu1 %925 }
 0x800   :  { %2888 = vmatmul.mubr.msk.f32.vlgmr.msra.gmra.mrb[8].mxu1 %vm188_vm2, %v926_v29 }
 0x801   :  { %3128 = vmatpush3.bf16.msra.mxu1 %v3547_v36  ;;  %2909 = vmatprep.mubr.msk.f32.mxu1 %vm3372_vm1, %v3373_v10 }
 0x802   :  { %3129 = vmatprep.subr.bf16.mxu1 %v3371_v3 }
 0x805   :  { %3131 = vmatpush3.bf16.msra.mxu1 %v3560_v40 }
 0x806   :  { %3138 = vmatprep.subr.bf16.mxu1 %v3371_v3 }
 0x862   :  { %v851_v27 = vpop.permute.xlu0 %850 }
 0x863   :  { %2877 = vmatmul.mubr.msk.f32.vlgmr.msra.gmra.mrb[8].mxu0 %vm188_vm2, %v851_v27 }
 0x864   :  { %3122 = vmatpush3.bf16.msra.mxu0 %v3482_v4  ;;  %2898 = vmatprep.mubr.msk.f32.mxu0 %vm3372_vm1, %v3373_v10 }
 0x865   :  { %3123 = vmatprep.subr.bf16.mxu0 %v3371_v3 }
 0x868   :  { %3125 = vmatpush3.bf16.msra.mxu0 %v3497_v9 }
 0x869   :  { %3132 = vmatprep.subr.bf16.mxu0 %v3371_v3 }
 0x86b   :  { %2899 = vmatmul.mubr.msk.f32.vlgmr.msra.gmra.mrb[10].mxu0 %vm188_vm2, %v851_v27 }
 0x86c   :  { %3134 = vmatpush3.bf16.msra.mxu0 %v3536_v32  ;;  %2920 = vmatprep.mubr.msk.f32.mxu0 %vm3372_vm1, %v3373_v10 }
 0x86d   :  { %3135 = vmatprep.subr.bf16.mxu0 %v3371_v3 }
 0x870   :  { %3137 = vmatpush3.bf16.msra.mxu0 %v3556_v39 }
 0x871   :  { %3144 = vmatprep.subr.bf16.mxu0 %v3371_v3 }
 0x8d3   :  { %v995_v30 = vpop.f32.mrb[8].mxu1 }
 0x8d4   :  { %v996_v31 = vadd.f32 %v3582_v47, %v995_v30  ;;  %v2889_v33 = vpop.f32.mrb[9].mxu1 }
 0x8d6   :  { %1007 = vrot.lane.b32.xlu1 %v996_v31, %s3374_s18 }
 0x936   :  { %v920_v34 = vpop.f32.mrb[8].mxu0 }
 0x937   :  { %v921_v35 = vadd.f32 %v3603_v52, %v920_v34  ;;  %v2878_v37 = vpop.f32.mrb[9].mxu0 }
 0x939   :  { %v999_v38 = vadd.f32 %v996_v31, %v921_v35 }
 0x93b   :  { %v2622_v41 = vmul.f32 -1.442695, %v999_v38 }
 0x93d   :  { %3254 = vpow2.f32 %v2622_v41 }
 0x93e   :  { %v1091_v42 = vpop.f32.mrb[10].mxu0 }
 0x93f   :  { %v1092_v43 = vadd.f32 %v3518_v15, %v1091_v42  ;;  %v2900_v44 = vpop.f32.mrb[11].mxu0 }
 0x941   :  { %v1096_v45 = vrot.slane %v1092_v43, 2 }
 0x943   :  { %1105 = vrot.lane.b32.xlu0 %v1096_v45, %s3374_s18  ;;  %v1098_v53 = vadd.f32 %v1096_v45, %v3522_v19 }
 0x945   :  { %v2624_v54 = vmul.f32 -1.442695, %v1098_v53 }
 0x947   :  { %v3255_v46 = vpop.eup %3254 }
 0x948   :  { %v1003_v48 = vadd.f32 1.0, %v3255_v46  ;;  %v1008_v50 = vpop.permute.xlu1 %1007 }
 0x94a   :  { %3256 = vrcp.f32 %v1003_v48 }
 0x94b   :  { %3258 = vpow2.f32 %v2624_v54 }
 0x954   :  { %v3257_v49 = vpop.eup %3256 }
 0x955   :  { %v1010_v51 = vmul.f32 %v3257_v49, %v1008_v50  ;;  %v3259_v55 = vpop.eup %3258  ;;  %v1017_v2 = vsub.f32 1.0, %v3257_v49  ;;  %v1023_v6 = vmul.f32 %v3257_v49, %v3656_v20 }
 0x956   :  { %v1102_v56 = vadd.f32 1.0, %v3259_v55 }
 0x957   :  { %1012 = vrot.lane.b32.xlu1 %v1010_v51, %s3374_s18 }
 0x958   :  { %3260 = vrcp.f32 %v1102_v56 }
 0x962   :  { %v3261_v57 = vpop.eup %3260 }
 0x963   :  { %v1115_v12 = vsub.f32 1.0, %v3261_v57  ;;  %v1123_v16 = vmul.f32 %v3261_v57, %v1121_v11 }
 0x9b5   :  { %v1106_v58 = vpop.permute.xlu0 %1105 }
 0x9b6   :  { %v1108_v59 = vmul.f32 %v3261_v57, %v1106_v58 }
 0x9b8   :  { %1110 = vrot.lane.b32.xlu0 %v1108_v59, %s3374_s18 }
 0x9c9   :  { %v1013_v60 = vpop.permute.xlu1 %1012 }
 0x9ca   :  { %v1015_v61 = vadd.f32 %v1013_v60, %v921_v35 }
 0x9cc   :  { %3262 = vtanh.f32 %v1015_v61 }
 0x9d6   :  { %v3263_v62 = vpop.eup %3262 }
 0x9d7   :  { %1019 = vrot.lane.b32.xlu1 %v3263_v62, %s3375_s5 }
 0xa2a   :  { %v1111_v63 = vpop.permute.xlu0 %1110 }
 0xa2b   :  { %v1113_v0 = vadd.f32 %v1111_v63, %v3522_v19 }
 0xa2d   :  { %3264 = vtanh.f32 %v1113_v0 }
 0xa37   :  { %v3265_v1 = vpop.eup %3264 }
 0xa38   :  { %1117 = vrot.lane.b32.xlu0 %v3265_v1, %s3375_s5 }
 0xa49   :  { %v1020_v5 = vpop.permute.xlu1 %1019 }
 0xa4a   :  { %v1022_v7 = vmul.f32 %v1020_v5, %v1017_v2 }
 0xa4c   :  { %v3698_v8 = vadd.f32 %v1023_v6, %v1022_v7 }
 0xa4e   :  { %1202 = vrot.lane.b32.xlu1 %v3698_v8, %s3375_s5 }
 0xaaa   :  { %v1118_v14 = vpop.permute.xlu0 %1117 }
 0xaab   :  { %v1120_v19 = vmul.f32 %v1118_v14, %v1115_v12 }
 0xaad   :  { %v3703_v17 = vadd.f32 %v1123_v16, %v1120_v19 }
 0xaaf   :  { %v1126_v18 = vrot.slane %v3703_v17, 6 }
 0xab1   :  { %1127 = vrot.lane.b32.xlu0 %v1126_v18, %s3375_s5 }
 0xac0   :  { %v1203_v20 = vpop.permute.xlu1 %1202 }
 0xac1   :  { %2921 = vmatmul.mubr.msk.f32.vlgmr.msra.gmra.mrb[12].mxu0 %vm188_vm2, %v1203_v20 }
 0xac2   :  { %3146 = vmatpush3.bf16.msra.mxu0 %v3547_v36  ;;  %2942 = vmatprep.mubr.msk.f32.mxu0 %vm3372_vm1, %v3373_v10 }
 0xac3   :  { %3147 = vmatprep.subr.bf16.mxu0 %v3371_v3 }
 0xac6   :  { %3149 = vmatpush3.bf16.msra.mxu0 %v3560_v40 }
 0xac7   :  { %3156 = vmatprep.subr.bf16.mxu0 %v3371_v3 }
 0xb23   :  { %v1128_v21 = vpop.permute.xlu0 %1127 }
 0xb24   :  { %2910 = vmatmul.mubr.msk.f32.vlgmr.msra.gmra.mrb[10].mxu1 %vm188_vm2, %v1128_v21 }
 0xb25   :  { %3140 = vmatpush3.bf16.msra.mxu1 %v3482_v4  ;;  %2931 = vmatprep.mubr.msk.f32.mxu1 %vm3372_vm1, %v3373_v10 }
 0xb26   :  { %3141 = vmatprep.subr.bf16.mxu1 %v3371_v3 }
 0xb29   :  { %3143 = vmatpush3.bf16.msra.mxu1 %v3497_v9 }
 0xb2a   :  { %3150 = vmatprep.subr.bf16.mxu1 %v3371_v3 }
 0xb2c   :  { %2932 = vmatmul.mubr.msk.f32.vlgmr.msra.gmra.mrb[12].mxu1 %vm188_vm2, %v1128_v21 }
 0xb2d   :  { %3152 = vmatpush3.bf16.msra.mxu1 %v3536_v32  ;;  %2953 = vmatprep.mubr.msk.f32.mxu1 %vm3372_vm1, %v3373_v10 }
 0xb2e   :  { %3153 = vmatprep.subr.bf16.mxu1 %v3371_v3 }
 0xb31   :  { %3155 = vmatpush3.bf16.msra.mxu1 %v3556_v39 }
 0xb32   :  { %3162 = vmatprep.subr.bf16.mxu1 %v3371_v3 }
 0xb94   :  { %v1272_v22 = vpop.f32.mrb[12].mxu0 }
 0xb95   :  { %v1273_v23 = vadd.f32 %v3582_v47, %v1272_v22  ;;  %v2922_v24 = vpop.f32.mrb[13].mxu0 }
 0xb97   :  { %1284 = vrot.lane.b32.xlu1 %v1273_v23, %s3374_s18 }
 0xbf7   :  { %v1197_v25 = vpop.f32.mrb[10].mxu1 }
 0xbf8   :  { %v1198_v26 = vadd.f32 %v3603_v52, %v1197_v25  ;;  %v2911_v28 = vpop.f32.mrb[11].mxu1 }
 0xbfa   :  { %v1276_v29 = vadd.f32 %v1273_v23, %v1198_v26 }
 0xbfc   :  { %v2627_v27 = vmul.f32 -1.442695, %v1276_v29 }
 0xbfe   :  { %3266 = vpow2.f32 %v2627_v27 }
 0xbff   :  { %v1368_v30 = vpop.f32.mrb[12].mxu1 }
 0xc00   :  { %v1369_v31 = vadd.f32 %v3518_v15, %v1368_v30  ;;  %v2933_v33 = vpop.f32.mrb[13].mxu1 }
 0xc02   :  { %1380 = vrot.lane.b32.xlu0 %v1369_v31, %s3374_s18  ;;  %v1372_v42 = vadd.f32 %v1369_v31, %v3513_v13 }
 0xc04   :  { %v2629_v43 = vmul.f32 -1.442695, %v1372_v42 }
 0xc08   :  { %v3267_v34 = vpop.eup %3266 }
 0xc09   :  { %v1280_v35 = vadd.f32 1.0, %v3267_v34  ;;  %v1285_v38 = vpop.permute.xlu1 %1284 }
 0xc0b   :  { %3268 = vrcp.f32 %v1280_v35 }
 0xc0c   :  { %3270 = vpow2.f32 %v2629_v43 }
 0xc15   :  { %v3269_v37 = vpop.eup %3268 }
 0xc16   :  { %v1287_v41 = vmul.f32 %v3269_v37, %v1285_v38  ;;  %v3271_v44 = vpop.eup %3270  ;;  %v1294_v57 = vsub.f32 1.0, %v3269_v37  ;;  %v1300_v59 = vmul.f32 %v3269_v37, %v3698_v8 }
 0xc17   :  { %v1376_v45 = vadd.f32 1.0, %v3271_v44 }
 0xc18   :  { %1289 = vrot.lane.b32.xlu1 %v1287_v41, %s3374_s18 }
 0xc19   :  { %3272 = vrcp.f32 %v1376_v45 }
 0xc23   :  { %v3273_v46 = vpop.eup %3272 }
 0xc24   :  { %v1390_v62 = vsub.f32 1.0, %v3273_v46  ;;  %v1397_v0 = vmul.f32 %v3273_v46, %v1126_v18 }
 0xc74   :  { %v1381_v48 = vpop.permute.xlu0 %1380 }
 0xc75   :  { %v1383_v49 = vmul.f32 %v3273_v46, %v1381_v48 }
 0xc77   :  { %1385 = vrot.lane.b32.xlu0 %v1383_v49, %s3374_s18 }
 0xc8a   :  { %v1290_v50 = vpop.permute.xlu1 %1289 }
 0xc8b   :  { %v1292_v51 = vadd.f32 %v1290_v50, %v1198_v26 }
 0xc8d   :  { %3274 = vtanh.f32 %v1292_v51 }
 0xc97   :  { %v3275_v53 = vpop.eup %3274 }
 0xc98   :  { %1296 = vrot.lane.b32.xlu1 %v3275_v53, %s3375_s5 }
 0xce9   :  { %v1386_v54 = vpop.permute.xlu0 %1385 }
 0xcea   :  { %v1388_v55 = vadd.f32 %v1386_v54, %v3513_v13 }
 0xcec   :  { %3276 = vtanh.f32 %v1388_v55 }
 0xcf6   :  { %v3277_v56 = vpop.eup %3276 }
 0xcf7   :  { %1392 = vrot.lane.b32.xlu0 %v3277_v56, %s3375_s5 }
 0xd0a   :  { %v1297_v58 = vpop.permute.xlu1 %1296 }
 0xd0b   :  { %v1299_v60 = vmul.f32 %v1297_v58, %v1294_v57 }
 0xd0d   :  { %v3742_v61 = vadd.f32 %v1300_v59, %v1299_v60 }
 0xd0f   :  { %1475 = vrot.lane.b32.xlu1 %v3742_v61, %s3375_s5 }
 0xd69   :  { %v1393_v63 = vpop.permute.xlu0 %1392 }
 0xd6a   :  { %v1395_v1 = vmul.f32 %v1393_v63, %v1390_v62 }
 0xd6c   :  { %v3748_v2 = vadd.f32 %v1397_v0, %v1395_v1 }
 0xd6e   :  { %1400 = vrot.lane.b32.xlu0 %v3748_v2, %s3375_s5  ;;  %v1671_v51 = vrot.slane %v3748_v2, 6 }
 0xd81   :  { %v1476_v5 = vpop.permute.xlu1 %1475 }
 0xd82   :  { %2954 = vmatmul.mubr.msk.f32.vlgmr.msra.gmra.mrb[14].mxu1 %vm188_vm2, %v1476_v5 }
 0xd83   :  { %3164 = vmatpush3.bf16.msra.mxu1 %v3547_v36  ;;  %2975 = vmatprep.mubr.msk.f32.mxu1 %vm3372_vm1, %v3373_v10 }
 0xd84   :  { %3165 = vmatprep.subr.bf16.mxu1 %v3371_v3 }
 0xd87   :  { %3167 = vmatpush3.bf16.msra.mxu1 %v3560_v40 }
 0xd88   :  { %3174 = vmatprep.subr.bf16.mxu1 %v3371_v3 }
 0xde0   :  { %v1401_v6 = vpop.permute.xlu0 %1400 }
 0xde1   :  { %2943 = vmatmul.mubr.msk.f32.vlgmr.msra.gmra.mrb[14].mxu0 %vm188_vm2, %v1401_v6 }
 0xde2   :  { %3158 = vmatpush3.bf16.msra.mxu0 %v3482_v4  ;;  %2964 = vmatprep.mubr.msk.f32.mxu0 %vm3372_vm1, %v3373_v10 }
 0xde3   :  { %3159 = vmatprep.subr.bf16.mxu0 %v3371_v3 }
 0xde6   :  { %3161 = vmatpush3.bf16.msra.mxu0 %v3497_v9 }
 0xde7   :  { %3168 = vmatprep.subr.bf16.mxu0 %v3371_v3 }
 0xde9   :  { %2965 = vmatmul.mubr.msk.f32.vlgmr.msra.gmra.mrb[16].mxu0 %vm188_vm2, %v1401_v6 }
 0xdea   :  { %3170 = vmatpush3.bf16.msra.mxu0 %v3536_v32  ;;  %2986 = vmatprep.mubr.msk.f32.mxu0 %vm3372_vm1, %v3373_v10 }
 0xdeb   :  { %3171 = vmatprep.subr.bf16.mxu0 %v3371_v3 }
 0xdee   :  { %3173 = vmatpush3.bf16.msra.mxu0 %v3556_v39 }
 0xdef   :  { %3180 = vmatprep.subr.bf16.mxu0 %v3371_v3 }
 0xe55   :  { %v1545_v7 = vpop.f32.mrb[14].mxu1 }
 0xe56   :  { %v1546_v8 = vadd.f32 %v3582_v47, %v1545_v7  ;;  %v2955_v11 = vpop.f32.mrb[15].mxu1 }
 0xe58   :  { %1557 = vrot.lane.b32.xlu0 %v1546_v8, %s3374_s18 }
 0xeb4   :  { %v1470_v12 = vpop.f32.mrb[14].mxu0 }
 0xeb5   :  { %v1471_v14 = vadd.f32 %v3603_v52, %v1470_v12  ;;  %v2944_v16 = vpop.f32.mrb[15].mxu0 }
 0xeb7   :  { %v1549_v19 = vadd.f32 %v1546_v8, %v1471_v14 }
 0xeb9   :  { %v2632_v17 = vmul.f32 -1.442695, %v1549_v19 }
 0xebb   :  { %3278 = vpow2.f32 %v2632_v17 }
 0xebc   :  { %v1641_v18 = vpop.f32.mrb[16].mxu0 }
 0xebd   :  { %v1642_v20 = vadd.f32 %v3518_v15, %v1641_v18  ;;  %v2966_v21 = vpop.f32.mrb[17].mxu0 }
 0xebf   :  { %v1646_v22 = vrot.slane %v1642_v20, 6 }
 0xec1   :  { %1655 = vrot.lane.b32.xlu1 %v1646_v22, %s3374_s18  ;;  %v1648_v29 = vadd.f32 %v1646_v22, %v3513_v13 }
 0xec3   :  { %v2634_v27 = vmul.f32 -1.442695, %v1648_v29 }
 0xec5   :  { %v3279_v23 = vpop.eup %3278 }
 0xec6   :  { %v1553_v24 = vadd.f32 1.0, %v3279_v23 }
 0xec8   :  { %3280 = vrcp.f32 %v1553_v24 }
 0xec9   :  { %3282 = vpow2.f32 %v2634_v27 }
 0xeca   :  { %v1558_v26 = vpop.permute.xlu0 %1557 }
 0xed2   :  { %v3281_v25 = vpop.eup %3280 }
 0xed3   :  { %v1560_v28 = vmul.f32 %v3281_v25, %v1558_v26  ;;  %v3283_v30 = vpop.eup %3282  ;;  %v1567_v45 = vsub.f32 1.0, %v3281_v25  ;;  %v1573_v48 = vmul.f32 %v3281_v25, %v3742_v61 }
 0xed4   :  { %v1652_v31 = vadd.f32 1.0, %v3283_v30 }
 0xed5   :  { %1562 = vrot.lane.b32.xlu0 %v1560_v28, %s3374_s18 }
 0xed6   :  { %3284 = vrcp.f32 %v1652_v31 }
 0xee0   :  { %v3285_v33 = vpop.eup %3284 }
 0xee1   :  { %v1665_v53 = vsub.f32 1.0, %v3285_v33  ;;  %v1673_v56 = vmul.f32 %v3285_v33, %v1671_v51 }
 0xf33   :  { %v1656_v34 = vpop.permute.xlu1 %1655 }
 0xf34   :  { %v1658_v35 = vmul.f32 %v3285_v33, %v1656_v34 }
 0xf36   :  { %1660 = vrot.lane.b32.xlu1 %v1658_v35, %s3374_s18 }
 0xf47   :  { %v1563_v37 = vpop.permute.xlu0 %1562 }
 0xf48   :  { %v1565_v38 = vadd.f32 %v1563_v37, %v1471_v14 }
 0xf4a   :  { %3286 = vtanh.f32 %v1565_v38 }
 0xf54   :  { %v3287_v41 = vpop.eup %3286 }
 0xf55   :  { %1569 = vrot.lane.b32.xlu0 %v3287_v41, %s3375_s5 }
 0xfa8   :  { %v1661_v42 = vpop.permute.xlu1 %1660 }
 0xfa9   :  { %v1663_v43 = vadd.f32 %v1661_v42, %v3513_v13 }
 0xfab   :  { %3288 = vtanh.f32 %v1663_v43 }
 0xfb5   :  { %v3289_v44 = vpop.eup %3288 }
 0xfb6   :  { %1667 = vrot.lane.b32.xlu1 %v3289_v44, %s3375_s5 }
 0xfc7   :  { %v1570_v46 = vpop.permute.xlu0 %1569 }
 0xfc8   :  { %v1572_v49 = vmul.f32 %v1570_v46, %v1567_v45 }
 0xfca   :  { %v3785_v50 = vadd.f32 %v1573_v48, %v1572_v49 }
 0xfcc   :  { %1752 = vrot.lane.b32.xlu0 %v3785_v50, %s3375_s5 }
0x1028   :  { %v1668_v54 = vpop.permute.xlu1 %1667 }
0x1029   :  { %v1670_v55 = vmul.f32 %v1668_v54, %v1665_v53 }
0x102b   :  { %v3790_v57 = vadd.f32 %v1673_v56, %v1670_v55  ;;  %v3328_v56 = vld [vmem:[%s3923_s4] ss:$0 sm:$0xff] }
0x102d   :  { %v1676_v58 = vrot.slane %v3790_v57, 2  ;;  %v1948_v41 = vrot.slane %v3790_v57, 6 }
0x102f   :  { %1677 = vrot.lane.b32.xlu1 %v1676_v58, %s3375_s5 }
0x103e   :  { %v1753_v59 = vpop.permute.xlu0 %1752 }
0x103f   :  { %2987 = vmatmul.mubr.msk.f32.vlgmr.msra.gmra.mrb[18].mxu0 %vm188_vm2, %v1753_v59 }
0x1040   :  { %3182 = vmatpush3.bf16.msra.mxu0 %v3547_v36  ;;  %3008 = vmatprep.mubr.msk.f32.mxu0 %vm3372_vm1, %v3373_v10 }
0x1041   :  { %3183 = vmatprep.subr.bf16.mxu0 %v3371_v3 }
0x1044   :  { %3185 = vmatpush3.bf16.msra.mxu0 %v3560_v40 }
0x1045   :  { %3192 = vmatprep.subr.bf16.mxu0 %v3371_v3 }
0x10a1   :  { %v1678_v60 = vpop.permute.xlu1 %1677 }
0x10a2   :  { %2976 = vmatmul.mubr.msk.f32.vlgmr.msra.gmra.mrb[16].mxu1 %vm188_vm2, %v1678_v60 }
0x10a3   :  { %3176 = vmatpush3.bf16.msra.mxu1 %v3482_v4  ;;  %2997 = vmatprep.mubr.msk.f32.mxu1 %vm3372_vm1, %v3373_v10 }
0x10a4   :  { %3177 = vmatprep.subr.bf16.mxu1 %v3371_v3 }
0x10a7   :  { %3179 = vmatpush3.bf16.msra.mxu1 %v3497_v9 }
0x10a8   :  { %3186 = vmatprep.subr.bf16.mxu1 %v3371_v3 }
0x10aa   :  { %2998 = vmatmul.mubr.msk.f32.vlgmr.msra.gmra.mrb[18].mxu1 %vm188_vm2, %v1678_v60 }
0x10ab   :  { %3188 = vmatpush3.bf16.msra.mxu1 %v3536_v32  ;;  %3019 = vmatprep.mubr.msk.f32.mxu1 %vm3372_vm1, %v3373_v10 }
0x10ac   :  { %3189 = vmatprep.subr.bf16.mxu1 %v3371_v3 }
0x10af   :  { %3191 = vmatpush3.bf16.msra.mxu1 %v3556_v39 }
0x10b0   :  { %3198 = vmatprep.subr.bf16.mxu1 %v3371_v3 }
0x1112   :  { %v1822_v61 = vpop.f32.mrb[18].mxu0 }
0x1113   :  { %v1823_v62 = vadd.f32 %v3582_v47, %v1822_v61  ;;  %v2988_v63 = vpop.f32.mrb[19].mxu0 }
0x1115   :  { %1834 = vrot.lane.b32.xlu0 %v1823_v62, %s3374_s18 }
0x1175   :  { %v1747_v0 = vpop.f32.mrb[16].mxu1 }
0x1176   :  { %v1748_v1 = vadd.f32 %v3603_v52, %v1747_v0  ;;  %v2977_v2 = vpop.f32.mrb[17].mxu1 }
0x1178   :  { %v1826_v5 = vadd.f32 %v1823_v62, %v1748_v1 }
0x117a   :  { %v2637_v6 = vmul.f32 -1.442695, %v1826_v5 }
0x117c   :  { %3290 = vpow2.f32 %v2637_v6 }
0x117d   :  { %v1918_v7 = vpop.f32.mrb[18].mxu1 }
0x117e   :  { %v1919_v8 = vadd.f32 %v3518_v15, %v1918_v7  ;;  %v2999_v11 = vpop.f32.mrb[19].mxu1 }
0x1180   :  { %v1923_v12 = vrot.slane %v1919_v8, 4 }
0x1182   :  { %1932 = vrot.lane.b32.xlu1 %v1923_v12, %s3374_s18  ;;  %v1925_v20 = vadd.f32 %v1923_v12, %v3513_v13 }
0x1184   :  { %v2639_v21 = vmul.f32 -1.442695, %v1925_v20 }
0x1186   :  { %v3291_v14 = vpop.eup %3290 }
0x1187   :  { %v1830_v16 = vadd.f32 1.0, %v3291_v14  ;;  %v1835_v17 = vpop.permute.xlu0 %1834 }
0x1189   :  { %3292 = vrcp.f32 %v1830_v16 }
0x118a   :  { %3294 = vpow2.f32 %v2639_v21 }
0x1193   :  { %v3293_v19 = vpop.eup %3292 }
0x1194   :  { %v1837_v18 = vmul.f32 %v3293_v19, %v1835_v17  ;;  %v3295_v22 = vpop.eup %3294  ;;  %v1844_v33 = vsub.f32 1.0, %v3293_v19  ;;  %v1850_v35 = vmul.f32 %v3293_v19, %v3785_v50 }
0x1195   :  { %v1929_v23 = vadd.f32 1.0, %v3295_v22 }
0x1196   :  { %1839 = vrot.lane.b32.xlu0 %v1837_v18, %s3374_s18 }
0x1197   :  { %3296 = vrcp.f32 %v1929_v23 }
0x11a1   :  { %v3297_v15 = vpop.eup %3296 }
0x11a2   :  { %v1942_v42 = vsub.f32 1.0, %v3297_v15  ;;  %v1950_v44 = vmul.f32 %v3297_v15, %v1948_v41 }
0x11f4   :  { %v1933_v24 = vpop.permute.xlu1 %1932 }
0x11f5   :  { %v1935_v25 = vmul.f32 %v3297_v15, %v1933_v24 }
0x11f7   :  { %1937 = vrot.lane.b32.xlu1 %v1935_v25, %s3374_s18 }
0x1208   :  { %v1840_v26 = vpop.permute.xlu0 %1839 }
0x1209   :  { %v1842_v28 = vadd.f32 %v1840_v26, %v1748_v1 }
0x120b   :  { %3298 = vtanh.f32 %v1842_v28 }
0x1215   :  { %v3299_v29 = vpop.eup %3298 }
0x1216   :  { %1846 = vrot.lane.b32.xlu0 %v3299_v29, %s3375_s5 }
0x1269   :  { %v1938_v27 = vpop.permute.xlu1 %1937 }
0x126a   :  { %v1940_v30 = vadd.f32 %v1938_v27, %v3513_v13 }
0x126c   :  { %3300 = vtanh.f32 %v1940_v30  ;;  %v3329_v30 = vld [vmem:[%s3927_s8] ss:$0 sm:$0xff] }
0x1276   :  { %v3301_v31 = vpop.eup %3300 }
0x1277   :  { %1944 = vrot.lane.b32.xlu1 %v3301_v31, %s3375_s5 }
0x1288   :  { %v1847_v34 = vpop.permute.xlu0 %1846 }
0x1289   :  { %v1849_v37 = vmul.f32 %v1847_v34, %v1844_v33 }
0x128b   :  { %v3827_v38 = vadd.f32 %v1850_v35, %v1849_v37  ;;  %v3330_v35 = vld [vmem:[%s3926_s7] ss:$0 sm:$0xff] }
0x128d   :  { %2029 = vrot.lane.b32.xlu0 %v3827_v38, %s3375_s5 }
0x12e9   :  { %v1945_v43 = vpop.permute.xlu1 %1944 }
0x12ea   :  { %v1947_v45 = vmul.f32 %v1945_v43, %v1942_v42 }
0x12ec   :  { %v3832_v46 = vadd.f32 %v1950_v44, %v1947_v45 }
0x12ee   :  { %v1953_v48 = vrot.slane %v3832_v46, 4  ;;  %v2225_v22 = vrot.slane %v3832_v46, 6 }
0x12f0   :  { %1954 = vrot.lane.b32.xlu1 %v1953_v48, %s3375_s5 }
0x12ff   :  { %v2030_v49 = vpop.permute.xlu0 %2029 }
0x1300   :  { %3020 = vmatmul.mubr.msk.f32.vlgmr.msra.gmra.mrb[20].mxu1 %vm188_vm2, %v2030_v49 }
0x1301   :  { %3200 = vmatpush3.bf16.msra.mxu1 %v3547_v36  ;;  %3041 = vmatprep.mubr.msk.f32.mxu1 %vm3372_vm1, %v3373_v10 }
0x1302   :  { %3201 = vmatprep.subr.bf16.mxu1 %v3371_v3 }
0x1305   :  { %3203 = vmatpush3.bf16.msra.mxu1 %v3560_v40 }
0x1306   :  { %3210 = vmatprep.subr.bf16.mxu1 %v3371_v3 }
0x1362   :  { %v1955_v50 = vpop.permute.xlu1 %1954 }
0x1363   :  { %3009 = vmatmul.mubr.msk.f32.vlgmr.msra.gmra.mrb[20].mxu0 %vm188_vm2, %v1955_v50 }
0x1364   :  { %3194 = vmatpush3.bf16.msra.mxu0 %v3482_v4  ;;  %3030 = vmatprep.mubr.msk.f32.mxu0 %vm3372_vm1, %v3373_v10 }
0x1365   :  { %3195 = vmatprep.subr.bf16.mxu0 %v3371_v3 }
0x1368   :  { %3197 = vmatpush3.bf16.msra.mxu0 %v3497_v9 }
0x1369   :  { %3204 = vmatprep.subr.bf16.mxu0 %v3371_v3 }
0x136b   :  { %3031 = vmatmul.mubr.msk.f32.vlgmr.msra.gmra.mrb[22].mxu0 %vm188_vm2, %v1955_v50 }
0x136c   :  { %3206 = vmatpush3.bf16.msra.mxu0 %v3536_v32  ;;  %3052 = vmatprep.mubr.msk.f32.mxu0 %vm3372_vm1, %v3373_v10 }
0x136d   :  { %3207 = vmatprep.subr.bf16.mxu0 %v3371_v3 }
0x1370   :  { %3209 = vmatpush3.bf16.msra.mxu0 %v3556_v39 }
0x13d3   :  { %v2099_v4 = vpop.f32.mrb[20].mxu1 }
0x13d4   :  { %v2100_v36 = vadd.f32 %v3582_v47, %v2099_v4  ;;  %v3021_v40 = vpop.f32.mrb[21].mxu1 }
0x13d6   :  { %2111 = vrot.lane.b32.xlu0 %v2100_v36, %s3374_s18 }
0x1436   :  { %v2024_v9 = vpop.f32.mrb[20].mxu0 }
0x1437   :  { %v2025_v51 = vadd.f32 %v3603_v52, %v2024_v9  ;;  %v3010_v53 = vpop.f32.mrb[21].mxu0 }
0x1439   :  { %v2103_v54 = vadd.f32 %v2100_v36, %v2025_v51 }
0x143b   :  { %v2642_v55 = vmul.f32 -1.442695, %v2103_v54 }
0x143d   :  { %3302 = vpow2.f32 %v2642_v55  ;;  %v2648_v55 = vld [vmem:[%s3928_s9] ss:$0 sm:$0xff] }
0x143e   :  { %v2195_v32 = vpop.f32.mrb[22].mxu0 }
0x143f   :  { %v2196_v57 = vadd.f32 %v3328_v56, %v2195_v32  ;;  %v3032_v39 = vpop.f32.mrb[23].mxu0 }
0x1441   :  { %v2200_v58 = vrot.slane %v2196_v57, 2 }
0x1443   :  { %2209 = vrot.lane.b32.xlu1 %v2200_v58, %s3374_s18  ;;  %v2202_v62 = vadd.f32 %v2200_v58, %v3513_v13 }
0x1445   :  { %v2644_v63 = vmul.f32 -1.442695, %v2202_v62 }
0x1447   :  { %v3303_v47 = vpop.eup %3302 }
0x1448   :  { %v2107_v59 = vadd.f32 1.0, %v3303_v47  ;;  %v2112_v61 = vpop.permute.xlu0 %2111 }
0x144a   :  { %3304 = vrcp.f32 %v2107_v59  ;;  %v2649_v59 = vld [vmem:[%s3929_s10] ss:$0 sm:$0xff]  ;;  %s2650_s10 = sld [smem:[#allocation5 + $0x1]] }
0x144b   :  { %3306 = vpow2.f32 %v2644_v63  ;;  %v2458_v63 = vld [vmem:[%s3930_s11 + $0x18] sm:$0xff] }
0x1454   :  { %v3305_v60 = vpop.eup %3304 }
0x1455   :  { %v2114_v52 = vmul.f32 %v3305_v60, %v2112_v61  ;;  %v3307_v0 = vpop.eup %3306  ;;  %v2121_v19 = vsub.f32 1.0, %v3305_v60  ;;  %v2127_v18 = vmul.f32 %v3305_v60, %v3827_v38  ;;  %v2455_v60 = vld [vmem:[%s3930_s11] sm:$0xff]  ;;  %v2456_v61 = vld [vmem:[%s3930_s11 + $0x8] sm:$0xff] }
0x1456   :  { %v2206_v1 = vadd.f32 1.0, %v3307_v0  ;;  %v3211_v62 = vpack.c.bf16 %v2456_v61, %v2455_v60 }
0x1457   :  { %2116 = vrot.lane.b32.xlu0 %v2114_v52, %s3374_s18  ;;  %v2457_v52 = vld [vmem:[%s3930_s11 + $0x10] sm:$0xff] }
0x1458   :  { %3308 = vrcp.f32 %v2206_v1  ;;  %v3214_v0 = vpack.c.bf16 %v2458_v63, %v2457_v52 }
0x1462   :  { %v3309_v2 = vpop.eup %3308 }
0x1463   :  { %v2219_v23 = vsub.f32 1.0, %v3309_v2  ;;  %v2227_v24 = vmul.f32 %v3309_v2, %v2225_v22 }
0x14b5   :  { %v2210_v5 = vpop.permute.xlu1 %2209 }
0x14b6   :  { %v2212_v6 = vmul.f32 %v3309_v2, %v2210_v5 }
0x14b8   :  { %2214 = vrot.lane.b32.xlu1 %v2212_v6, %s3374_s18 }
0x14c9   :  { %v2117_v7 = vpop.permute.xlu0 %2116 }
0x14ca   :  { %v2119_v8 = vadd.f32 %v2117_v7, %v2025_v51 }
0x14cc   :  { %3310 = vtanh.f32 %v2119_v8 }
0x14d6   :  { %v3311_v11 = vpop.eup %3310 }
0x14d7   :  { %2123 = vrot.lane.b32.xlu0 %v3311_v11, %s3375_s5 }
0x152a   :  { %v2215_v12 = vpop.permute.xlu1 %2214 }
0x152b   :  { %v2217_v14 = vadd.f32 %v2215_v12, %v3513_v13 }
0x152d   :  { %3312 = vtanh.f32 %v2217_v14 }
0x1537   :  { %v3313_v16 = vpop.eup %3312 }
0x1538   :  { %2221 = vrot.lane.b32.xlu1 %v3313_v16, %s3375_s5 }
0x1549   :  { %v2124_v17 = vpop.permute.xlu0 %2123 }
0x154a   :  { %v2126_v20 = vmul.f32 %v2124_v17, %v2121_v19 }
0x154c   :  { %v2128_v21 = vadd.f32 %v2127_v18, %v2126_v20  ;;  %v2655_v18 = vld [vmem:[%s3931_s12] ss:$0 sm:$0xff]  ;;  %s2449_s12 = sld [smem:[#allocation5]] }
0x154e   :  { %2306 = vrot.lane.b32.xlu0 %v2128_v21, %s3375_s5 }
0x15aa   :  { %v2222_v15 = vpop.permute.xlu1 %2221 }
0x15ab   :  { %v2224_v25 = vmul.f32 %v2222_v15, %v2219_v23 }
0x15ad   :  { %v2228_v26 = vadd.f32 %v2227_v24, %v2224_v25  ;;  %v2554_v25 = vstv %s2650_s10 }
0x15af   :  { %v2230_v13 = vrot.slane %v2228_v26, 6 }
0x15b1   :  { %2231 = vrot.lane.b32.xlu1 %v2230_v13, %s3375_s5 }
0x15c0   :  { %v2307_v28 = vpop.permute.xlu0 %2306 }
0x15c1   :  { %3053 = vmatmul.mubr.msk.f32.vlgmr.msra.gmra.mrb[24].mxu0 %vm188_vm2, %v2307_v28 }
0x1623   :  { %v2232_v29 = vpop.permute.xlu1 %2231 }
0x1624   :  { %3042 = vmatmul.mubr.msk.f32.vlgmr.msra.gmra.mrb[22].mxu1 %vm188_vm2, %v2232_v29 }
0x1625   :  { %3063 = vmatprep.mubr.msk.f32.mxu1 %vm3372_vm1, %v3373_v10  ;;  %3212 = vmatpush3.bf16.msra.mxu1 %v3211_v62 }
0x1626   :  { %3213 = vmatprep.subr.bf16.mxu1 %v3371_v3 }
0x1629   :  { %3215 = vmatpush3.bf16.msra.mxu1 %v3214_v0 }
0x1694   :  { %v2376_v27 = vpop.f32.mrb[24].mxu0 }
0x1695   :  { %v2377_v31 = vadd.f32 %v3329_v30, %v2376_v27  ;;  %v3054_v33 = vpop.f32.mrb[25].mxu0  ;;  %v2572_v27 = vstv %s2651_s1 }
0x1697   :  { %2388 = vrot.lane.b32.xlu0 %v2377_v31, %s3374_s18 }
0x16f7   :  { %v2301_v34 = vpop.f32.mrb[22].mxu1 }
0x16f8   :  { %v2302_v37 = vadd.f32 %v3330_v35, %v2301_v34  ;;  %v3043_v38 = vpop.f32.mrb[23].mxu1 }
0x16fa   :  { %v2380_v41 = vadd.f32 %v2377_v31, %v2302_v37 }
0x16fc   :  { %v2647_v42 = vmul.f32 -1.442695, %v2380_v41 }
0x16fe   :  { %3314 = vpow2.f32 %v2647_v42 }
0x1708   :  { %v3315_v10 = vpop.eup %3314 }
0x1709   :  { %v2384_v43 = vadd.f32 1.0, %v3315_v10  ;;  %v2389_v45 = vpop.permute.xlu0 %2388 }
0x170b   :  { %3316 = vrcp.f32 %v2384_v43 }
0x1715   :  { %v3317_v44 = vpop.eup %3316 }
0x1716   :  { %v2391_v46 = vmul.f32 %v3317_v44, %v2389_v45  ;;  %v2398_v4 = vsub.f32 1.0, %v3317_v44  ;;  %v2404_v40 = vmul.f32 %v3317_v44, %v2128_v21 }
0x1718   :  { %2393 = vrot.lane.b32.xlu1 %v2391_v46, %s3374_s18  ;;  %s3376_s18 = smov 32  }
0x178a   :  { %v2394_v48 = vpop.permute.xlu1 %2393 }
0x178b   :  { %v2396_v49 = vadd.f32 %v2394_v48, %v2302_v37 }
0x178d   :  { %3318 = vtanh.f32 %v2396_v49  ;;  %v2577_v49 = vstv %s2449_s12 }
0x1797   :  { %v3319_v50 = vpop.eup %3318 }
0x1798   :  { %2400 = vrot.lane.b32.xlu0 %v3319_v50, %s3375_s5 }
0x180a   :  { %v2401_v36 = vpop.permute.xlu0 %2400 }
0x180b   :  { %v2403_v9 = vmul.f32 %v2401_v36, %v2398_v4  ;;  %v2657_v4 = vld [vmem:[#allocation2] ss:$0 sm:$0xff] }
0x180d   :  { %v2405_v51 = vadd.f32 %v2404_v40, %v2403_v9 }
0x180f   :  { %2407 = vrot.lane.b32.xlu1 %v2405_v51, %s3375_s5 }
0x1881   :  { %v2408_v53 = vpop.permute.xlu1 %2407 }
0x1882   :  { %v2411_v54 = vsel %vm2410_vm3, %v2408_v53, 0.0 }
0x1883   :  { %2412 = vadd.xlane.f32.xlu0 %v2411_v54 }
0x1899   :  { %2435 = vrot.lane.b32.xlu0 %v2648_v55, %s3376_s18 }
0x1910   :  { %v2413_v32 = vpop.xlane.xlu0 %2412 }
0x1911   :  { %v2415_v56 = vmul.f32 0.03125, %v2413_v32  ;;  %v2594_v32 = vstv %s2654_s6 }
0x1913   :  { %v2416_v57 = vsub.f32 %v2405_v51, %v2415_v56  ;;  %v2590_v51 = vstv %s2652_s14 }
0x1914   :  { %v2436_v7 = vpop.permute.xlu0 %2435 }
0x1915   :  { %v2417_v39 = vmul.f32 %v2416_v57, %v2416_v57 }
0x1917   :  { %2419 = vrot.lane.b32.xlu1 %v2417_v39, %s3375_s5 }
0x1989   :  { %v2420_v58 = vpop.permute.xlu1 %2419 }
0x198a   :  { %v2422_v47 = vsel %vm2410_vm3, %v2420_v58, 0.0 }
0x198b   :  { %2423 = vadd.xlane.f32.xlu1 %v2422_v47 }
0x199c   :  { %2445 = vrot.lane.b32.xlu1 %v2649_v59, %s3376_s18 }
0x1a18   :  { %v2424_v1 = vpop.xlane.xlu1 %2423 }
0x1a19   :  { %v2425_v2 = vmul.f32 0.03125, %v2424_v1 }
0x1a1b   :  { %v2426_v5 = vadd.f32 1e-05, %v2425_v2 }
0x1a1c   :  { %v2446_v11 = vpop.permute.xlu1 %2445 }
0x1a1d   :  { %3320 = vrsqrt.f32 %v2426_v5 }
0x1a27   :  { %v3321_v6 = vpop.eup %3320 }
0x1a28   :  { %v2428_v8 = vmul.f32 %v3321_v6, %v2416_v57 }
0x1a2a   :  { %v2438_v12 = vmul.f32 %v2436_v7, %v2428_v8 }
0x1a2c   :  { %v2448_v14 = vadd.f32 %v2446_v11, %v2438_v12 }
0x1a2e   :  { %2477 = vrot.lane.b32.xlu0 %v2448_v14, %s3375_s5  ;;  %v2461_v16 = vmul.f32 %v2448_v14, %v2448_v14 }
0x1a32   :  { %2463 = vrot.lane.b32.xlu0 %v2461_v16, %s3375_s5  ;;  %s2653_s5 = sld [smem:[#allocation5 + $0x4]] }
0x1a38   :  { %v2592_v53 = vstv %s2653_s5 }
0x1aa0   :  { %v2478_v19 = vpop.permute.xlu0 %2477 }
0x1aa1   :  { %3064 = vmatmul.mubr.msk.f32.vlgmr.msra.gmra.mrb[24].mxu1 %vm188_vm2, %v2478_v19 }
0x1aa4   :  { %v2464_v3 = vpop.permute.xlu0 %2463 }
0x1aa5   :  { %v2466_v17 = vsel %vm2410_vm3, %v2464_v3, 0.0 }
0x1aa6   :  { %2467 = vadd.xlane.f32.xlu1 %v2466_v17 }
0x1b33   :  { %v2468_v20 = vpop.xlane.xlu1 %2467 }
0x1b34   :  { %v2475_v22 = vadd.f32 %v2655_v18, %v2468_v20 }
0x1b74   :  { %v2547_v21 = vpop.f32.mrb[24].mxu1 }
0x1b75   :  { %v2551_v23 = vmul.f32 2.0, %v2547_v21  ;;  %v3065_v15 = vpop.f32.mrb[25].mxu1 }
0x1b77   :  { %v2552_v24 = vsub.f32 %v2475_v22, %v2551_v23 }
0x1b79   :  { %v2553_v26 = vmax.f32 %v2552_v24, 0.0 }
0x1b7b   :  { %v2555_v13 = vmul.f32 %v2554_v25, %v2553_v26  ;;  %v2571_v28 = vmul.f32 -0.5, %v2553_v26 }
0x1b7d   :  { %3322 = vrsqrt.f32 %v2555_v13  ;;  %vm2558_vm4 = vcmp.eq.f32.partialorder %v2555_v13, inf  ;;  %v2561_v31 = vand.u32 2147483648, %v2555_v13  ;;  %v2573_v33 = vmul.f32 %v2572_v27, %v2571_v28 }
0x1b7e   :  { %vm2560_vm5 = vcmp.eq.f32.partialorder %v2555_v13, 0.0  ;;  %v2565_v43 = vmul.f32 1.6666666, %v2555_v13 }
0x1b7f   :  { %v2574_v38 = vmul.f32 1.442695, %v2573_v33 }
0x1b87   :  { %v3323_v29 = vpop.eup %3322 }
0x1b88   :  { %v2557_v30 = vmul.f32 %v3323_v29, %v2555_v13 }
0x1b8a   :  { %v2559_v34 = vsel %vm2558_vm4, %v2555_v13, %v2557_v30 }
0x1b8b   :  { %v2562_v35 = vsel %vm2560_vm5, %v2561_v31, %v2559_v34 }
0x1b8c   :  { %v2567_v37 = vmul.f32 -2.236068, %v2562_v35  ;;  %v2563_v42 = vmul.f32 2.236068, %v2562_v35 }
0x1b8e   :  { %v2568_v41 = vmul.f32 1.442695, %v2567_v37  ;;  %v2564_v10 = vadd.f32 1.0, %v2563_v42 }
0x1b90   :  { %3324 = vpow2.f32 %v2568_v41  ;;  %v2566_v44 = vadd.f32 %v2565_v43, %v2564_v10 }
0x1b91   :  { %3326 = vpow2.f32 %v2574_v38 }
0x1b9a   :  { %v3325_v45 = vpop.eup %3324 }
0x1b9b   :  { %v2570_v46 = vmul.f32 %v3325_v45, %v2566_v44  ;;  %v3327_v48 = vpop.eup %3326 }
0x1b9d   :  { %v2576_v50 = vadd.f32 %v3327_v48, %v2570_v46 }
0x1b9f   :  { %v2578_v36 = vmul.f32 %v2577_v49, %v2576_v50 }
0x1ba1   :  { %v2585_v40 = vmul.f32 %v2657_v4, %v2578_v36 }
0x1ba3   :  { %v2587_v9 = vsel %vm2586_vm6, %v2585_v40, 0.0 }
0x1ba4   :  { %2588 = vadd.xlane.f32.xlu0 %v2587_v9 }
0x1c31   :  { %v2589_v54 = vpop.xlane.xlu0 %2588 }
0x1c32   :  { %v2591_v55 = vadd.f32 %v2590_v51, %v2589_v54 }
0x1c34   :  { %v2593_v56 = vmul.f32 %v2592_v53, %v2591_v55 }
0x1c36   :  { %v2595_v57 = vadd.f32 %v2594_v32, %v2593_v56 }
0x1c38   :  { %2597 = vst.msk [vmem:[%s3934_s15] sm:$0x3] %vm2596_vm7, %v2595_v57 }
0x1c39   :  { %2602 = vsyncpa [#allocation3], 1 }
0x1c3a   :  { %2603 = vsyncpa [#allocation4], 1 }

</bundles_post_ra>
